<compile_context>
chip_gen: v5e
topology: v5e:2x2
jax: 0.10.0
libtpu: 0.0.40
codegen_flags: <defaults>
</compile_context>

<pallas_src>
import jax
import jax.numpy as jnp
from jax.experimental import pallas as pl
from jax.experimental.pallas import tpu as pltpu

VMEM = pltpu.MemorySpace.VMEM
LN_EPS = 1e-5  # PyTorch nn.LayerNorm default


# ----------------------------------------------------------------------------
# In-kernel helpers
# ----------------------------------------------------------------------------
def _ln(x, g, b):
    mu = jnp.mean(x, axis=-1, keepdims=True)
    xc = x - mu
    var = jnp.mean(xc * xc, axis=-1, keepdims=True)
    return xc * jax.lax.rsqrt(var + LN_EPS) * g + b


# ----------------------------------------------------------------------------
# Single fused forward kernel (embeddings + all layers + final LN + LM head)
# ----------------------------------------------------------------------------
def _forward_kernel(idx_ref, tok_ref, pos_ref, mask_ref,
                    ln1g_ref, ln1b_ref, wq_ref, wk_ref, wv_ref, wo_ref, bo_ref,
                    ln2g_ref, ln2b_ref, w1_ref, b1_ref, w2_ref, b2_ref,
                    lnfg_ref, lnfb_ref, wlm_ref, blm_ref,
                    o_ref):
    n_layer, n_head, c, hd = wq_ref.shape
    bt = idx_ref.shape[0]          # B * T
    vocab = tok_ref.shape[0]
    scale = 1.0 / (hd ** 0.5)

    # --- token embedding gather as a one-hot matmul (MXU) + position add ---
    ids = idx_ref[...]                                             # (BT, 1) i32
    vio = jax.lax.broadcasted_iota(jnp.int32, (bt, vocab), 1)
    onehot = (vio == ids).astype(jnp.float32)                      # (BT, V)
    x = jnp.dot(onehot, tok_ref[...],
                preferred_element_type=jnp.float32) + pos_ref[...]  # (BT, C)

    # Block-diagonal causal additive mask, precomputed outside (loaded once).
    mask = mask_ref[...]                                           # (BT, BT)

    for L in range(n_layer):
        # ---- LN1 + multi-head causal SDPA + out-proj + residual ----
        h = _ln(x, ln1g_ref[L], ln1b_ref[L])
        sa = jnp.zeros((bt, c), jnp.float32)
        for hh in range(n_head):
            # Per-head weights indexed on leading axes (no lane-dim slicing).
            qh = jnp.dot(h, wq_ref[L, hh],
                         preferred_element_type=jnp.float32).astype(jnp.bfloat16)
            kh = jnp.dot(h, wk_ref[L, hh],
                         preferred_element_type=jnp.float32).astype(jnp.bfloat16)
            vh = jnp.dot(h, wv_ref[L, hh],
                         preferred_element_type=jnp.float32).astype(jnp.bfloat16)

            s = jax.lax.dot_general(qh, kh, (((1,), (1,)), ((), ())),
                                    preferred_element_type=jnp.float32)
            s = s * scale + mask                       # fp32 masking, fp32 softmax
            s = s - jnp.max(s, axis=-1, keepdims=True)
            p = jnp.exp(s)
            p = p * pl.reciprocal(jnp.sum(p, axis=-1, keepdims=True), approx=True)

            oh = jnp.dot(p.astype(jnp.bfloat16), vh,
                         preferred_element_type=jnp.float32)
            # concat(heads) @ Wo  ==  sum_h  oh_h @ Wo[h]
            sa = sa + jnp.dot(oh, wo_ref[L, hh],
                              preferred_element_type=jnp.float32)
        x = x + sa + bo_ref[L]                         # out-proj bias + residual 1

        # ---- LN2 + FeedForward: Linear -> ReLU -> Linear -> ReLU (as in ref) ----
        h2 = _ln(x, ln2g_ref[L], ln2b_ref[L])
        f = jnp.maximum(jnp.dot(h2, w1_ref[L],
                                preferred_element_type=jnp.float32) + b1_ref[L], 0.0)
        f = jnp.maximum(jnp.dot(f, w2_ref[L],
                                preferred_element_type=jnp.float32) + b2_ref[L], 0.0)
        x = x + f                                      # residual 2

    # ---- final LayerNorm + LM head (vocab padded to 128-lane multiple) ----
    hf = _ln(x, lnfg_ref[...], lnfb_ref[...])
    o_ref[...] = (jnp.dot(hf, wlm_ref[...], preferred_element_type=jnp.float32)
                  + blm_ref[...]).astype(o_ref.dtype)


# ----------------------------------------------------------------------------
# Parameter init (deterministic, PyTorch-style uniform(-1/sqrt(fan_in), ...))
# ----------------------------------------------------------------------------
def init_params(key, block_size, vocab_size, n_embd, n_head, n_layer):
    hd = n_embd // n_head
    v_pad = ((vocab_size + 127) // 128) * 128   # lane-dense LM-head output

    def uni(k, shape, fan_in):
        bound = 1.0 / (fan_in ** 0.5)
        return jax.random.uniform(k, shape, jnp.float32, -bound, bound)

    keys = iter(jax.random.split(key, 16))
    w_lm = uni(next(keys), (n_embd, vocab_size), n_embd)
    b_lm = uni(next(keys), (1, vocab_size), n_embd)

    return {
        "vocab_size": vocab_size,
        "tok_emb": jax.random.normal(next(keys), (vocab_size, n_embd), jnp.float32),
        "pos_emb": jax.random.normal(next(keys), (block_size, n_embd), jnp.float32),
        # per-head K/Q/V Linear(bias=False) weights stacked on leading axes
        "ln1_g": jnp.ones((n_layer, 1, n_embd), jnp.float32),
        "ln1_b": jnp.zeros((n_layer, 1, n_embd), jnp.float32),
        "wq": uni(next(keys), (n_layer, n_head, n_embd, hd), n_embd),
        "wk": uni(next(keys), (n_layer, n_head, n_embd, hd), n_embd),
        "wv": uni(next(keys), (n_layer, n_head, n_embd, hd), n_embd),
        "wo": uni(next(keys), (n_layer, n_head, hd, n_embd), n_embd),
        "bo": uni(next(keys), (n_layer, 1, n_embd), n_embd),
        "ln2_g": jnp.ones((n_layer, 1, n_embd), jnp.float32),
        "ln2_b": jnp.zeros((n_layer, 1, n_embd), jnp.float32),
        "w1": uni(next(keys), (n_layer, n_embd, 4 * n_embd), n_embd),
        "b1": uni(next(keys), (n_layer, 1, 4 * n_embd), n_embd),
        "w2": uni(next(keys), (n_layer, 4 * n_embd, n_embd), 4 * n_embd),
        "b2": uni(next(keys), (n_layer, 1, n_embd), 4 * n_embd),
        "lnf_g": jnp.ones((1, n_embd), jnp.float32),
        "lnf_b": jnp.zeros((1, n_embd), jnp.float32),
        # zero-pad LM head columns so the kernel's output store is unmasked
        "w_lm": jnp.pad(w_lm, ((0, 0), (0, v_pad - vocab_size))),
        "b_lm": jnp.pad(b_lm, ((0, 0), (0, v_pad - vocab_size))),
    }


# ----------------------------------------------------------------------------
# Forward pass: one fused Pallas kernel; only the loss (if any) stays in XLA
# ----------------------------------------------------------------------------
def bingram_forward(params, idx, targets=None):
    B, T = idx.shape
    C = params["tok_emb"].shape[1]
    V = params["vocab_size"]
    Vp = params["w_lm"].shape[1]

    # Tiny (compile-time-shaped) prep: flat indices, tiled positions, and the
    # block-diagonal causal additive mask (all hoisted out of the kernel).
    idx_flat = idx.reshape(B * T, 1).astype(jnp.int32)
    pos = jnp.tile(params["pos_emb"][:T], (B, 1))                   # (B*T, C)
    r = jnp.arange(B * T, dtype=jnp.int32)
    allowed = (r[None, :] <= r[:, None]) & ((r[:, None] // T) == (r[None, :] // T))
    mask_bias = jnp.where(allowed, 0.0, -1e30).astype(jnp.float32)  # (B*T, B*T)

    args = (idx_flat, params["tok_emb"], pos, mask_bias,
            params["ln1_g"], params["ln1_b"], params["wq"], params["wk"],
            params["wv"], params["wo"], params["bo"],
            params["ln2_g"], params["ln2_b"], params["w1"], params["b1"],
            params["w2"], params["b2"],
            params["lnf_g"], params["lnf_b"], params["w_lm"], params["b_lm"])

    logits_padded = pl.pallas_call(
        _forward_kernel,
        out_shape=jax.ShapeDtypeStruct((B * T, Vp), jnp.float32),
        in_specs=[pl.BlockSpec(memory_space=VMEM)] * len(args),
        out_specs=pl.BlockSpec(memory_space=VMEM),
    )(*args)

    logits = logits_padded[:, :V].reshape(B, T, V)

    loss = None
    if targets is not None:
        # TODO(synk): cross-entropy loss kept in XLA (tiny, and outside the hot path).
        lg = logits.reshape(B * T, V)
        lse = jax.nn.logsumexp(lg, axis=-1)
        nll = lse - jnp.take_along_axis(lg, targets.reshape(B * T, 1), axis=-1)[:, 0]
        loss = jnp.mean(nll)
    return logits, loss


# ----------------------------------------------------------------------------
if __name__ == "__main__":
    block_size = 8
    vocab_size = 64
    n_embd = 32
    n_head = 4
    n_layer = 2
    dropout = 0.0  # declared in the module but never applied in forward()

    key = jax.random.PRNGKey(0)
    k_params, k_idx = jax.random.split(key)
    params = init_params(k_params, block_size, vocab_size, n_embd, n_head, n_layer)

    B, T = 2, block_size
    idx = jax.random.randint(k_idx, (B, T), 0, vocab_size, dtype=jnp.int32)

    logits, loss = bingram_forward(params, idx, targets=None)
    logits = jax.block_until_ready(logits)

    assert logits.shape == (B, T, vocab_size)
    assert logits.dtype == jnp.float32
    assert loss is None
    print("KERNEL_OK")
</pallas_src>

<mosaic_0001>
module attributes {stable_mosaic.version = 11 : i64} {
  func.func @_forward_kernel(%arg0: memref<16x1xi32, #tpu.memory_space<vmem>>, %arg1: memref<64x32xf32, #tpu.memory_space<vmem>>, %arg2: memref<16x32xf32, #tpu.memory_space<vmem>>, %arg3: memref<16x16xf32, #tpu.memory_space<vmem>>, %arg4: memref<2x1x32xf32, #tpu.memory_space<vmem>>, %arg5: memref<2x1x32xf32, #tpu.memory_space<vmem>>, %arg6: memref<2x4x32x8xf32, #tpu.memory_space<vmem>>, %arg7: memref<2x4x32x8xf32, #tpu.memory_space<vmem>>, %arg8: memref<2x4x32x8xf32, #tpu.memory_space<vmem>>, %arg9: memref<2x4x8x32xf32, #tpu.memory_space<vmem>>, %arg10: memref<2x1x32xf32, #tpu.memory_space<vmem>>, %arg11: memref<2x1x32xf32, #tpu.memory_space<vmem>>, %arg12: memref<2x1x32xf32, #tpu.memory_space<vmem>>, %arg13: memref<2x32x128xf32, #tpu.memory_space<vmem>>, %arg14: memref<2x1x128xf32, #tpu.memory_space<vmem>>, %arg15: memref<2x128x32xf32, #tpu.memory_space<vmem>>, %arg16: memref<2x1x32xf32, #tpu.memory_space<vmem>>, %arg17: memref<1x32xf32, #tpu.memory_space<vmem>>, %arg18: memref<1x32xf32, #tpu.memory_space<vmem>>, %arg19: memref<32x128xf32, #tpu.memory_space<vmem>>, %arg20: memref<1x128xf32, #tpu.memory_space<vmem>>, %arg21: memref<16x128xf32, #tpu.memory_space<vmem>>) attributes {dimension_semantics = [], scalar_prefetch = 0 : i64, scratch_operands = 0 : i64, tpu.core_type = #tpu.core_type<tc>} {
    %c0 = arith.constant 0 : index
    %c0_0 = arith.constant 0 : index
    %0 = vector.load %arg0[%c0, %c0_0] : memref<16x1xi32, #tpu.memory_space<vmem>>, vector<16x1xi32>
    %1 = tpu.iota {dimensions = array<i32: 1>} : vector<16x64xi32>
    %2 = vector.broadcast %0 : vector<16x1xi32> to vector<16x64xi32>
    %3 = arith.cmpi eq, %1, %2 : vector<16x64xi32>
    %4 = arith.extui %3 : vector<16x64xi1> to vector<16x64xi32>
    %5 = arith.sitofp %4 : vector<16x64xi32> to vector<16x64xf32>
    %c0_1 = arith.constant 0 : index
    %c0_2 = arith.constant 0 : index
    %6 = vector.load %arg1[%c0_1, %c0_2] : memref<64x32xf32, #tpu.memory_space<vmem>>, vector<64x32xf32>
    %cst = arith.constant dense<0.000000e+00> : vector<16x32xf32>
    %7 = tpu.matmul %5, %6, %cst {dimension_numbers = #tpu.dot_dimension_numbers<[1], [0], [0], [1], [0, 0, 1, 1], [], []>} : vector<16x64xf32>, vector<64x32xf32>, vector<16x32xf32> -> vector<16x32xf32>
    %c0_3 = arith.constant 0 : index
    %c0_4 = arith.constant 0 : index
    %8 = vector.load %arg2[%c0_3, %c0_4] : memref<16x32xf32, #tpu.memory_space<vmem>>, vector<16x32xf32>
    %9 = arith.addf %7, %8 : vector<16x32xf32>
    %c0_5 = arith.constant 0 : index
    %c0_6 = arith.constant 0 : index
    %10 = vector.load %arg3[%c0_5, %c0_6] : memref<16x16xf32, #tpu.memory_space<vmem>>, vector<16x16xf32>
    %c0_7 = arith.constant 0 : index
    %c0_8 = arith.constant 0 : index
    %c0_9 = arith.constant 0 : index
    %11 = vector.load %arg4[%c0_7, %c0_8, %c0_9] : memref<2x1x32xf32, #tpu.memory_space<vmem>>, vector<1x1x32xf32>
    %12 = vector.shape_cast %11 : vector<1x1x32xf32> to vector<1x32xf32>
    %c0_10 = arith.constant 0 : index
    %c0_11 = arith.constant 0 : index
    %c0_12 = arith.constant 0 : index
    %13 = vector.load %arg5[%c0_10, %c0_11, %c0_12] : memref<2x1x32xf32, #tpu.memory_space<vmem>>, vector<1x1x32xf32>
    %14 = vector.shape_cast %13 : vector<1x1x32xf32> to vector<1x32xf32>
    %cst_13 = arith.constant dense<0.000000e+00> : vector<16xf32>
    %15 = vector.multi_reduction <add>, %9, %cst_13 [1] : vector<16x32xf32> to vector<16xf32>
    %16 = vector.shape_cast %15 : vector<16xf32> to vector<16x1xf32>
    %cst_14 = arith.constant 3.200000e+01 : f32
    %17 = vector.broadcast %cst_14 : f32 to vector<16x1xf32>
    %18 = arith.divf %16, %17 : vector<16x1xf32>
    %19 = vector.broadcast %18 : vector<16x1xf32> to vector<16x32xf32>
    %20 = arith.subf %9, %19 : vector<16x32xf32>
    %21 = arith.mulf %20, %20 : vector<16x32xf32>
    %cst_15 = arith.constant dense<0.000000e+00> : vector<16xf32>
    %22 = vector.multi_reduction <add>, %21, %cst_15 [1] : vector<16x32xf32> to vector<16xf32>
    %23 = vector.shape_cast %22 : vector<16xf32> to vector<16x1xf32>
    %cst_16 = arith.constant 3.200000e+01 : f32
    %24 = vector.broadcast %cst_16 : f32 to vector<16x1xf32>
    %25 = arith.divf %23, %24 : vector<16x1xf32>
    %cst_17 = arith.constant 9.99999974E-6 : f32
    %26 = vector.broadcast %cst_17 : f32 to vector<16x1xf32>
    %27 = arith.addf %25, %26 : vector<16x1xf32>
    %28 = math.rsqrt %27 : vector<16x1xf32>
    %29 = vector.broadcast %28 : vector<16x1xf32> to vector<16x32xf32>
    %30 = arith.mulf %20, %29 : vector<16x32xf32>
    %31 = vector.broadcast %12 : vector<1x32xf32> to vector<16x32xf32>
    %32 = arith.mulf %30, %31 : vector<16x32xf32>
    %33 = vector.broadcast %14 : vector<1x32xf32> to vector<16x32xf32>
    %34 = arith.addf %32, %33 : vector<16x32xf32>
    %cst_18 = arith.constant 0.000000e+00 : f32
    %35 = vector.broadcast %cst_18 : f32 to vector<16x32xf32>
    %c0_19 = arith.constant 0 : index
    %c0_20 = arith.constant 0 : index
    %c0_21 = arith.constant 0 : index
    %c0_22 = arith.constant 0 : index
    %36 = vector.load %arg6[%c0_19, %c0_20, %c0_21, %c0_22] : memref<2x4x32x8xf32, #tpu.memory_space<vmem>>, vector<1x1x32x8xf32>
    %37 = vector.shape_cast %36 : vector<1x1x32x8xf32> to vector<32x8xf32>
    %cst_23 = arith.constant dense<0.000000e+00> : vector<16x8xf32>
    %38 = tpu.matmul %34, %37, %cst_23 {dimension_numbers = #tpu.dot_dimension_numbers<[1], [0], [0], [1], [0, 0, 1, 1], [], []>} : vector<16x32xf32>, vector<32x8xf32>, vector<16x8xf32> -> vector<16x8xf32>
    %39 = arith.truncf %38 : vector<16x8xf32> to vector<16x8xbf16>
    %c0_24 = arith.constant 0 : index
    %c0_25 = arith.constant 0 : index
    %c0_26 = arith.constant 0 : index
    %c0_27 = arith.constant 0 : index
    %40 = vector.load %arg7[%c0_24, %c0_25, %c0_26, %c0_27] : memref<2x4x32x8xf32, #tpu.memory_space<vmem>>, vector<1x1x32x8xf32>
    %41 = vector.shape_cast %40 : vector<1x1x32x8xf32> to vector<32x8xf32>
    %cst_28 = arith.constant dense<0.000000e+00> : vector<16x8xf32>
    %42 = tpu.matmul %34, %41, %cst_28 {dimension_numbers = #tpu.dot_dimension_numbers<[1], [0], [0], [1], [0, 0, 1, 1], [], []>} : vector<16x32xf32>, vector<32x8xf32>, vector<16x8xf32> -> vector<16x8xf32>
    %43 = arith.truncf %42 : vector<16x8xf32> to vector<16x8xbf16>
    %c0_29 = arith.constant 0 : index
    %c0_30 = arith.constant 0 : index
    %c0_31 = arith.constant 0 : index
    %c0_32 = arith.constant 0 : index
    %44 = vector.load %arg8[%c0_29, %c0_30, %c0_31, %c0_32] : memref<2x4x32x8xf32, #tpu.memory_space<vmem>>, vector<1x1x32x8xf32>
    %45 = vector.shape_cast %44 : vector<1x1x32x8xf32> to vector<32x8xf32>
    %cst_33 = arith.constant dense<0.000000e+00> : vector<16x8xf32>
    %46 = tpu.matmul %34, %45, %cst_33 {dimension_numbers = #tpu.dot_dimension_numbers<[1], [0], [0], [1], [0, 0, 1, 1], [], []>} : vector<16x32xf32>, vector<32x8xf32>, vector<16x8xf32> -> vector<16x8xf32>
    %47 = arith.truncf %46 : vector<16x8xf32> to vector<16x8xbf16>
    %cst_34 = arith.constant dense<0.000000e+00> : vector<16x16xf32>
    %48 = tpu.matmul %39, %43, %cst_34 {dimension_numbers = #tpu.dot_dimension_numbers<[1], [1], [0], [0], [0, 0, 1, 0], [], []>} : vector<16x8xbf16>, vector<16x8xbf16>, vector<16x16xf32> -> vector<16x16xf32>
    %cst_35 = arith.constant 0.353553385 : f32
    %49 = vector.broadcast %cst_35 : f32 to vector<16x16xf32>
    %50 = arith.mulf %48, %49 : vector<16x16xf32>
    %51 = arith.addf %50, %10 : vector<16x16xf32>
    %cst_36 = arith.constant dense<0xFF800000> : vector<16xf32>
    %52 = vector.multi_reduction <maximumf>, %51, %cst_36 [1] : vector<16x16xf32> to vector<16xf32>
    %53 = vector.shape_cast %52 : vector<16xf32> to vector<16x1xf32>
    %54 = vector.broadcast %53 : vector<16x1xf32> to vector<16x16xf32>
    %55 = arith.subf %51, %54 : vector<16x16xf32>
    %56 = math.exp %55 : vector<16x16xf32>
    %cst_37 = arith.constant dense<0.000000e+00> : vector<16xf32>
    %57 = vector.multi_reduction <add>, %56, %cst_37 [1] : vector<16x16xf32> to vector<16xf32>
    %58 = vector.shape_cast %57 : vector<16xf32> to vector<16x1xf32>
    %59 = tpu.reciprocal %58 {approx = true} : vector<16x1xf32> -> vector<16x1xf32>
    %60 = vector.broadcast %59 : vector<16x1xf32> to vector<16x16xf32>
    %61 = arith.mulf %56, %60 : vector<16x16xf32>
    %62 = arith.truncf %61 : vector<16x16xf32> to vector<16x16xbf16>
    %cst_38 = arith.constant dense<0.000000e+00> : vector<16x8xf32>
    %63 = tpu.matmul %62, %47, %cst_38 {dimension_numbers = #tpu.dot_dimension_numbers<[1], [0], [0], [1], [0, 0, 1, 1], [], []>} : vector<16x16xbf16>, vector<16x8xbf16>, vector<16x8xf32> -> vector<16x8xf32>
    %c0_39 = arith.constant 0 : index
    %c0_40 = arith.constant 0 : index
    %c0_41 = arith.constant 0 : index
    %c0_42 = arith.constant 0 : index
    %64 = vector.load %arg9[%c0_39, %c0_40, %c0_41, %c0_42] : memref<2x4x8x32xf32, #tpu.memory_space<vmem>>, vector<1x1x8x32xf32>
    %65 = vector.shape_cast %64 : vector<1x1x8x32xf32> to vector<8x32xf32>
    %cst_43 = arith.constant dense<0.000000e+00> : vector<16x32xf32>
    %66 = tpu.matmul %63, %65, %cst_43 {dimension_numbers = #tpu.dot_dimension_numbers<[1], [0], [0], [1], [0, 0, 1, 1], [], []>} : vector<16x8xf32>, vector<8x32xf32>, vector<16x32xf32> -> vector<16x32xf32>
    %67 = arith.addf %35, %66 : vector<16x32xf32>
    %c0_44 = arith.constant 0 : index
    %c1 = arith.constant 1 : index
    %c0_45 = arith.constant 0 : index
    %c0_46 = arith.constant 0 : index
    %68 = vector.load %arg6[%c0_44, %c1, %c0_45, %c0_46] : memref<2x4x32x8xf32, #tpu.memory_space<vmem>>, vector<1x1x32x8xf32>
    %69 = vector.shape_cast %68 : vector<1x1x32x8xf32> to vector<32x8xf32>
    %cst_47 = arith.constant dense<0.000000e+00> : vector<16x8xf32>
    %70 = tpu.matmul %34, %69, %cst_47 {dimension_numbers = #tpu.dot_dimension_numbers<[1], [0], [0], [1], [0, 0, 1, 1], [], []>} : vector<16x32xf32>, vector<32x8xf32>, vector<16x8xf32> -> vector<16x8xf32>
    %71 = arith.truncf %70 : vector<16x8xf32> to vector<16x8xbf16>
    %c0_48 = arith.constant 0 : index
    %c1_49 = arith.constant 1 : index
    %c0_50 = arith.constant 0 : index
    %c0_51 = arith.constant 0 : index
    %72 = vector.load %arg7[%c0_48, %c1_49, %c0_50, %c0_51] : memref<2x4x32x8xf32, #tpu.memory_space<vmem>>, vector<1x1x32x8xf32>
    %73 = vector.shape_cast %72 : vector<1x1x32x8xf32> to vector<32x8xf32>
    %cst_52 = arith.constant dense<0.000000e+00> : vector<16x8xf32>
    %74 = tpu.matmul %34, %73, %cst_52 {dimension_numbers = #tpu.dot_dimension_numbers<[1], [0], [0], [1], [0, 0, 1, 1], [], []>} : vector<16x32xf32>, vector<32x8xf32>, vector<16x8xf32> -> vector<16x8xf32>
    %75 = arith.truncf %74 : vector<16x8xf32> to vector<16x8xbf16>
    %c0_53 = arith.constant 0 : index
    %c1_54 = arith.constant 1 : index
    %c0_55 = arith.constant 0 : index
    %c0_56 = arith.constant 0 : index
    %76 = vector.load %arg8[%c0_53, %c1_54, %c0_55, %c0_56] : memref<2x4x32x8xf32, #tpu.memory_space<vmem>>, vector<1x1x32x8xf32>
    %77 = vector.shape_cast %76 : vector<1x1x32x8xf32> to vector<32x8xf32>
    %cst_57 = arith.constant dense<0.000000e+00> : vector<16x8xf32>
    %78 = tpu.matmul %34, %77, %cst_57 {dimension_numbers = #tpu.dot_dimension_numbers<[1], [0], [0], [1], [0, 0, 1, 1], [], []>} : vector<16x32xf32>, vector<32x8xf32>, vector<16x8xf32> -> vector<16x8xf32>
    %79 = arith.truncf %78 : vector<16x8xf32> to vector<16x8xbf16>
    %cst_58 = arith.constant dense<0.000000e+00> : vector<16x16xf32>
    %80 = tpu.matmul %71, %75, %cst_58 {dimension_numbers = #tpu.dot_dimension_numbers<[1], [1], [0], [0], [0, 0, 1, 0], [], []>} : vector<16x8xbf16>, vector<16x8xbf16>, vector<16x16xf32> -> vector<16x16xf32>
    %cst_59 = arith.constant 0.353553385 : f32
    %81 = vector.broadcast %cst_59 : f32 to vector<16x16xf32>
    %82 = arith.mulf %80, %81 : vector<16x16xf32>
    %83 = arith.addf %82, %10 : vector<16x16xf32>
    %cst_60 = arith.constant dense<0xFF800000> : vector<16xf32>
    %84 = vector.multi_reduction <maximumf>, %83, %cst_60 [1] : vector<16x16xf32> to vector<16xf32>
    %85 = vector.shape_cast %84 : vector<16xf32> to vector<16x1xf32>
    %86 = vector.broadcast %85 : vector<16x1xf32> to vector<16x16xf32>
    %87 = arith.subf %83, %86 : vector<16x16xf32>
    %88 = math.exp %87 : vector<16x16xf32>
    %cst_61 = arith.constant dense<0.000000e+00> : vector<16xf32>
    %89 = vector.multi_reduction <add>, %88, %cst_61 [1] : vector<16x16xf32> to vector<16xf32>
    %90 = vector.shape_cast %89 : vector<16xf32> to vector<16x1xf32>
    %91 = tpu.reciprocal %90 {approx = true} : vector<16x1xf32> -> vector<16x1xf32>
    %92 = vector.broadcast %91 : vector<16x1xf32> to vector<16x16xf32>
    %93 = arith.mulf %88, %92 : vector<16x16xf32>
    %94 = arith.truncf %93 : vector<16x16xf32> to vector<16x16xbf16>
    %cst_62 = arith.constant dense<0.000000e+00> : vector<16x8xf32>
    %95 = tpu.matmul %94, %79, %cst_62 {dimension_numbers = #tpu.dot_dimension_numbers<[1], [0], [0], [1], [0, 0, 1, 1], [], []>} : vector<16x16xbf16>, vector<16x8xbf16>, vector<16x8xf32> -> vector<16x8xf32>
    %c0_63 = arith.constant 0 : index
    %c1_64 = arith.constant 1 : index
    %c0_65 = arith.constant 0 : index
    %c0_66 = arith.constant 0 : index
    %96 = vector.load %arg9[%c0_63, %c1_64, %c0_65, %c0_66] : memref<2x4x8x32xf32, #tpu.memory_space<vmem>>, vector<1x1x8x32xf32>
    %97 = vector.shape_cast %96 : vector<1x1x8x32xf32> to vector<8x32xf32>
    %cst_67 = arith.constant dense<0.000000e+00> : vector<16x32xf32>
    %98 = tpu.matmul %95, %97, %cst_67 {dimension_numbers = #tpu.dot_dimension_numbers<[1], [0], [0], [1], [0, 0, 1, 1], [], []>} : vector<16x8xf32>, vector<8x32xf32>, vector<16x32xf32> -> vector<16x32xf32>
    %99 = arith.addf %67, %98 : vector<16x32xf32>
    %c0_68 = arith.constant 0 : index
    %c2 = arith.constant 2 : index
    %c0_69 = arith.constant 0 : index
    %c0_70 = arith.constant 0 : index
    %100 = vector.load %arg6[%c0_68, %c2, %c0_69, %c0_70] : memref<2x4x32x8xf32, #tpu.memory_space<vmem>>, vector<1x1x32x8xf32>
    %101 = vector.shape_cast %100 : vector<1x1x32x8xf32> to vector<32x8xf32>
    %cst_71 = arith.constant dense<0.000000e+00> : vector<16x8xf32>
    %102 = tpu.matmul %34, %101, %cst_71 {dimension_numbers = #tpu.dot_dimension_numbers<[1], [0], [0], [1], [0, 0, 1, 1], [], []>} : vector<16x32xf32>, vector<32x8xf32>, vector<16x8xf32> -> vector<16x8xf32>
    %103 = arith.truncf %102 : vector<16x8xf32> to vector<16x8xbf16>
    %c0_72 = arith.constant 0 : index
    %c2_73 = arith.constant 2 : index
    %c0_74 = arith.constant 0 : index
    %c0_75 = arith.constant 0 : index
    %104 = vector.load %arg7[%c0_72, %c2_73, %c0_74, %c0_75] : memref<2x4x32x8xf32, #tpu.memory_space<vmem>>, vector<1x1x32x8xf32>
    %105 = vector.shape_cast %104 : vector<1x1x32x8xf32> to vector<32x8xf32>
    %cst_76 = arith.constant dense<0.000000e+00> : vector<16x8xf32>
    %106 = tpu.matmul %34, %105, %cst_76 {dimension_numbers = #tpu.dot_dimension_numbers<[1], [0], [0], [1], [0, 0, 1, 1], [], []>} : vector<16x32xf32>, vector<32x8xf32>, vector<16x8xf32> -> vector<16x8xf32>
    %107 = arith.truncf %106 : vector<16x8xf32> to vector<16x8xbf16>
    %c0_77 = arith.constant 0 : index
    %c2_78 = arith.constant 2 : index
    %c0_79 = arith.constant 0 : index
    %c0_80 = arith.constant 0 : index
    %108 = vector.load %arg8[%c0_77, %c2_78, %c0_79, %c0_80] : memref<2x4x32x8xf32, #tpu.memory_space<vmem>>, vector<1x1x32x8xf32>
    %109 = vector.shape_cast %108 : vector<1x1x32x8xf32> to vector<32x8xf32>
    %cst_81 = arith.constant dense<0.000000e+00> : vector<16x8xf32>
    %110 = tpu.matmul %34, %109, %cst_81 {dimension_numbers = #tpu.dot_dimension_numbers<[1], [0], [0], [1], [0, 0, 1, 1], [], []>} : vector<16x32xf32>, vector<32x8xf32>, vector<16x8xf32> -> vector<16x8xf32>
    %111 = arith.truncf %110 : vector<16x8xf32> to vector<16x8xbf16>
    %cst_82 = arith.constant dense<0.000000e+00> : vector<16x16xf32>
    %112 = tpu.matmul %103, %107, %cst_82 {dimension_numbers = #tpu.dot_dimension_numbers<[1], [1], [0], [0], [0, 0, 1, 0], [], []>} : vector<16x8xbf16>, vector<16x8xbf16>, vector<16x16xf32> -> vector<16x16xf32>
    %cst_83 = arith.constant 0.353553385 : f32
    %113 = vector.broadcast %cst_83 : f32 to vector<16x16xf32>
    %114 = arith.mulf %112, %113 : vector<16x16xf32>
    %115 = arith.addf %114, %10 : vector<16x16xf32>
    %cst_84 = arith.constant dense<0xFF800000> : vector<16xf32>
    %116 = vector.multi_reduction <maximumf>, %115, %cst_84 [1] : vector<16x16xf32> to vector<16xf32>
    %117 = vector.shape_cast %116 : vector<16xf32> to vector<16x1xf32>
    %118 = vector.broadcast %117 : vector<16x1xf32> to vector<16x16xf32>
    %119 = arith.subf %115, %118 : vector<16x16xf32>
    %120 = math.exp %119 : vector<16x16xf32>
    %cst_85 = arith.constant dense<0.000000e+00> : vector<16xf32>
    %121 = vector.multi_reduction <add>, %120, %cst_85 [1] : vector<16x16xf32> to vector<16xf32>
    %122 = vector.shape_cast %121 : vector<16xf32> to vector<16x1xf32>
    %123 = tpu.reciprocal %122 {approx = true} : vector<16x1xf32> -> vector<16x1xf32>
    %124 = vector.broadcast %123 : vector<16x1xf32> to vector<16x16xf32>
    %125 = arith.mulf %120, %124 : vector<16x16xf32>
    %126 = arith.truncf %125 : vector<16x16xf32> to vector<16x16xbf16>
    %cst_86 = arith.constant dense<0.000000e+00> : vector<16x8xf32>
    %127 = tpu.matmul %126, %111, %cst_86 {dimension_numbers = #tpu.dot_dimension_numbers<[1], [0], [0], [1], [0, 0, 1, 1], [], []>} : vector<16x16xbf16>, vector<16x8xbf16>, vector<16x8xf32> -> vector<16x8xf32>
    %c0_87 = arith.constant 0 : index
    %c2_88 = arith.constant 2 : index
    %c0_89 = arith.constant 0 : index
    %c0_90 = arith.constant 0 : index
    %128 = vector.load %arg9[%c0_87, %c2_88, %c0_89, %c0_90] : memref<2x4x8x32xf32, #tpu.memory_space<vmem>>, vector<1x1x8x32xf32>
    %129 = vector.shape_cast %128 : vector<1x1x8x32xf32> to vector<8x32xf32>
    %cst_91 = arith.constant dense<0.000000e+00> : vector<16x32xf32>
    %130 = tpu.matmul %127, %129, %cst_91 {dimension_numbers = #tpu.dot_dimension_numbers<[1], [0], [0], [1], [0, 0, 1, 1], [], []>} : vector<16x8xf32>, vector<8x32xf32>, vector<16x32xf32> -> vector<16x32xf32>
    %131 = arith.addf %99, %130 : vector<16x32xf32>
    %c0_92 = arith.constant 0 : index
    %c3 = arith.constant 3 : index
    %c0_93 = arith.constant 0 : index
    %c0_94 = arith.constant 0 : index
    %132 = vector.load %arg6[%c0_92, %c3, %c0_93, %c0_94] : memref<2x4x32x8xf32, #tpu.memory_space<vmem>>, vector<1x1x32x8xf32>
    %133 = vector.shape_cast %132 : vector<1x1x32x8xf32> to vector<32x8xf32>
    %cst_95 = arith.constant dense<0.000000e+00> : vector<16x8xf32>
    %134 = tpu.matmul %34, %133, %cst_95 {dimension_numbers = #tpu.dot_dimension_numbers<[1], [0], [0], [1], [0, 0, 1, 1], [], []>} : vector<16x32xf32>, vector<32x8xf32>, vector<16x8xf32> -> vector<16x8xf32>
    %135 = arith.truncf %134 : vector<16x8xf32> to vector<16x8xbf16>
    %c0_96 = arith.constant 0 : index
    %c3_97 = arith.constant 3 : index
    %c0_98 = arith.constant 0 : index
    %c0_99 = arith.constant 0 : index
    %136 = vector.load %arg7[%c0_96, %c3_97, %c0_98, %c0_99] : memref<2x4x32x8xf32, #tpu.memory_space<vmem>>, vector<1x1x32x8xf32>
    %137 = vector.shape_cast %136 : vector<1x1x32x8xf32> to vector<32x8xf32>
    %cst_100 = arith.constant dense<0.000000e+00> : vector<16x8xf32>
    %138 = tpu.matmul %34, %137, %cst_100 {dimension_numbers = #tpu.dot_dimension_numbers<[1], [0], [0], [1], [0, 0, 1, 1], [], []>} : vector<16x32xf32>, vector<32x8xf32>, vector<16x8xf32> -> vector<16x8xf32>
    %139 = arith.truncf %138 : vector<16x8xf32> to vector<16x8xbf16>
    %c0_101 = arith.constant 0 : index
    %c3_102 = arith.constant 3 : index
    %c0_103 = arith.constant 0 : index
    %c0_104 = arith.constant 0 : index
    %140 = vector.load %arg8[%c0_101, %c3_102, %c0_103, %c0_104] : memref<2x4x32x8xf32, #tpu.memory_space<vmem>>, vector<1x1x32x8xf32>
    %141 = vector.shape_cast %140 : vector<1x1x32x8xf32> to vector<32x8xf32>
    %cst_105 = arith.constant dense<0.000000e+00> : vector<16x8xf32>
    %142 = tpu.matmul %34, %141, %cst_105 {dimension_numbers = #tpu.dot_dimension_numbers<[1], [0], [0], [1], [0, 0, 1, 1], [], []>} : vector<16x32xf32>, vector<32x8xf32>, vector<16x8xf32> -> vector<16x8xf32>
    %143 = arith.truncf %142 : vector<16x8xf32> to vector<16x8xbf16>
    %cst_106 = arith.constant dense<0.000000e+00> : vector<16x16xf32>
    %144 = tpu.matmul %135, %139, %cst_106 {dimension_numbers = #tpu.dot_dimension_numbers<[1], [1], [0], [0], [0, 0, 1, 0], [], []>} : vector<16x8xbf16>, vector<16x8xbf16>, vector<16x16xf32> -> vector<16x16xf32>
    %cst_107 = arith.constant 0.353553385 : f32
    %145 = vector.broadcast %cst_107 : f32 to vector<16x16xf32>
    %146 = arith.mulf %144, %145 : vector<16x16xf32>
    %147 = arith.addf %146, %10 : vector<16x16xf32>
    %cst_108 = arith.constant dense<0xFF800000> : vector<16xf32>
    %148 = vector.multi_reduction <maximumf>, %147, %cst_108 [1] : vector<16x16xf32> to vector<16xf32>
    %149 = vector.shape_cast %148 : vector<16xf32> to vector<16x1xf32>
    %150 = vector.broadcast %149 : vector<16x1xf32> to vector<16x16xf32>
    %151 = arith.subf %147, %150 : vector<16x16xf32>
    %152 = math.exp %151 : vector<16x16xf32>
    %cst_109 = arith.constant dense<0.000000e+00> : vector<16xf32>
    %153 = vector.multi_reduction <add>, %152, %cst_109 [1] : vector<16x16xf32> to vector<16xf32>
    %154 = vector.shape_cast %153 : vector<16xf32> to vector<16x1xf32>
    %155 = tpu.reciprocal %154 {approx = true} : vector<16x1xf32> -> vector<16x1xf32>
    %156 = vector.broadcast %155 : vector<16x1xf32> to vector<16x16xf32>
    %157 = arith.mulf %152, %156 : vector<16x16xf32>
    %158 = arith.truncf %157 : vector<16x16xf32> to vector<16x16xbf16>
    %cst_110 = arith.constant dense<0.000000e+00> : vector<16x8xf32>
    %159 = tpu.matmul %158, %143, %cst_110 {dimension_numbers = #tpu.dot_dimension_numbers<[1], [0], [0], [1], [0, 0, 1, 1], [], []>} : vector<16x16xbf16>, vector<16x8xbf16>, vector<16x8xf32> -> vector<16x8xf32>
    %c0_111 = arith.constant 0 : index
    %c3_112 = arith.constant 3 : index
    %c0_113 = arith.constant 0 : index
    %c0_114 = arith.constant 0 : index
    %160 = vector.load %arg9[%c0_111, %c3_112, %c0_113, %c0_114] : memref<2x4x8x32xf32, #tpu.memory_space<vmem>>, vector<1x1x8x32xf32>
    %161 = vector.shape_cast %160 : vector<1x1x8x32xf32> to vector<8x32xf32>
    %cst_115 = arith.constant dense<0.000000e+00> : vector<16x32xf32>
    %162 = tpu.matmul %159, %161, %cst_115 {dimension_numbers = #tpu.dot_dimension_numbers<[1], [0], [0], [1], [0, 0, 1, 1], [], []>} : vector<16x8xf32>, vector<8x32xf32>, vector<16x32xf32> -> vector<16x32xf32>
    %163 = arith.addf %131, %162 : vector<16x32xf32>
    %164 = arith.addf %9, %163 : vector<16x32xf32>
    %c0_116 = arith.constant 0 : index
    %c0_117 = arith.constant 0 : index
    %c0_118 = arith.constant 0 : index
    %165 = vector.load %arg10[%c0_116, %c0_117, %c0_118] : memref<2x1x32xf32, #tpu.memory_space<vmem>>, vector<1x1x32xf32>
    %166 = vector.shape_cast %165 : vector<1x1x32xf32> to vector<1x32xf32>
    %167 = vector.broadcast %166 : vector<1x32xf32> to vector<16x32xf32>
    %168 = arith.addf %164, %167 : vector<16x32xf32>
    %c0_119 = arith.constant 0 : index
    %c0_120 = arith.constant 0 : index
    %c0_121 = arith.constant 0 : index
    %169 = vector.load %arg11[%c0_119, %c0_120, %c0_121] : memref<2x1x32xf32, #tpu.memory_space<vmem>>, vector<1x1x32xf32>
    %170 = vector.shape_cast %169 : vector<1x1x32xf32> to vector<1x32xf32>
    %c0_122 = arith.constant 0 : index
    %c0_123 = arith.constant 0 : index
    %c0_124 = arith.constant 0 : index
    %171 = vector.load %arg12[%c0_122, %c0_123, %c0_124] : memref<2x1x32xf32, #tpu.memory_space<vmem>>, vector<1x1x32xf32>
    %172 = vector.shape_cast %171 : vector<1x1x32xf32> to vector<1x32xf32>
    %cst_125 = arith.constant dense<0.000000e+00> : vector<16xf32>
    %173 = vector.multi_reduction <add>, %168, %cst_125 [1] : vector<16x32xf32> to vector<16xf32>
    %174 = vector.shape_cast %173 : vector<16xf32> to vector<16x1xf32>
    %cst_126 = arith.constant 3.200000e+01 : f32
    %175 = vector.broadcast %cst_126 : f32 to vector<16x1xf32>
    %176 = arith.divf %174, %175 : vector<16x1xf32>
    %177 = vector.broadcast %176 : vector<16x1xf32> to vector<16x32xf32>
    %178 = arith.subf %168, %177 : vector<16x32xf32>
    %179 = arith.mulf %178, %178 : vector<16x32xf32>
    %cst_127 = arith.constant dense<0.000000e+00> : vector<16xf32>
    %180 = vector.multi_reduction <add>, %179, %cst_127 [1] : vector<16x32xf32> to vector<16xf32>
    %181 = vector.shape_cast %180 : vector<16xf32> to vector<16x1xf32>
    %cst_128 = arith.constant 3.200000e+01 : f32
    %182 = vector.broadcast %cst_128 : f32 to vector<16x1xf32>
    %183 = arith.divf %181, %182 : vector<16x1xf32>
    %cst_129 = arith.constant 9.99999974E-6 : f32
    %184 = vector.broadcast %cst_129 : f32 to vector<16x1xf32>
    %185 = arith.addf %183, %184 : vector<16x1xf32>
    %186 = math.rsqrt %185 : vector<16x1xf32>
    %187 = vector.broadcast %186 : vector<16x1xf32> to vector<16x32xf32>
    %188 = arith.mulf %178, %187 : vector<16x32xf32>
    %189 = vector.broadcast %170 : vector<1x32xf32> to vector<16x32xf32>
    %190 = arith.mulf %188, %189 : vector<16x32xf32>
    %191 = vector.broadcast %172 : vector<1x32xf32> to vector<16x32xf32>
    %192 = arith.addf %190, %191 : vector<16x32xf32>
    %c0_130 = arith.constant 0 : index
    %c0_131 = arith.constant 0 : index
    %c0_132 = arith.constant 0 : index
    %193 = vector.load %arg13[%c0_130, %c0_131, %c0_132] : memref<2x32x128xf32, #tpu.memory_space<vmem>>, vector<1x32x128xf32>
    %194 = vector.shape_cast %193 : vector<1x32x128xf32> to vector<32x128xf32>
    %cst_133 = arith.constant dense<0.000000e+00> : vector<16x128xf32>
    %195 = tpu.matmul %192, %194, %cst_133 {dimension_numbers = #tpu.dot_dimension_numbers<[1], [0], [0], [1], [0, 0, 1, 1], [], []>} : vector<16x32xf32>, vector<32x128xf32>, vector<16x128xf32> -> vector<16x128xf32>
    %c0_134 = arith.constant 0 : index
    %c0_135 = arith.constant 0 : index
    %c0_136 = arith.constant 0 : index
    %196 = vector.load %arg14[%c0_134, %c0_135, %c0_136] : memref<2x1x128xf32, #tpu.memory_space<vmem>>, vector<1x1x128xf32>
    %197 = vector.shape_cast %196 : vector<1x1x128xf32> to vector<1x128xf32>
    %198 = vector.broadcast %197 : vector<1x128xf32> to vector<16x128xf32>
    %199 = arith.addf %195, %198 : vector<16x128xf32>
    %cst_137 = arith.constant 0.000000e+00 : f32
    %200 = vector.broadcast %cst_137 : f32 to vector<16x128xf32>
    %201 = arith.maximumf %199, %200 : vector<16x128xf32>
    %c0_138 = arith.constant 0 : index
    %c0_139 = arith.constant 0 : index
    %c0_140 = arith.constant 0 : index
    %202 = vector.load %arg15[%c0_138, %c0_139, %c0_140] : memref<2x128x32xf32, #tpu.memory_space<vmem>>, vector<1x128x32xf32>
    %203 = vector.shape_cast %202 : vector<1x128x32xf32> to vector<128x32xf32>
    %cst_141 = arith.constant dense<0.000000e+00> : vector<16x32xf32>
    %204 = tpu.matmul %201, %203, %cst_141 {dimension_numbers = #tpu.dot_dimension_numbers<[1], [0], [0], [1], [0, 0, 1, 1], [], []>} : vector<16x128xf32>, vector<128x32xf32>, vector<16x32xf32> -> vector<16x32xf32>
    %c0_142 = arith.constant 0 : index
    %c0_143 = arith.constant 0 : index
    %c0_144 = arith.constant 0 : index
    %205 = vector.load %arg16[%c0_142, %c0_143, %c0_144] : memref<2x1x32xf32, #tpu.memory_space<vmem>>, vector<1x1x32xf32>
    %206 = vector.shape_cast %205 : vector<1x1x32xf32> to vector<1x32xf32>
    %207 = vector.broadcast %206 : vector<1x32xf32> to vector<16x32xf32>
    %208 = arith.addf %204, %207 : vector<16x32xf32>
    %cst_145 = arith.constant 0.000000e+00 : f32
    %209 = vector.broadcast %cst_145 : f32 to vector<16x32xf32>
    %210 = arith.maximumf %208, %209 : vector<16x32xf32>
    %211 = arith.addf %168, %210 : vector<16x32xf32>
    %c1_146 = arith.constant 1 : index
    %c0_147 = arith.constant 0 : index
    %c0_148 = arith.constant 0 : index
    %212 = vector.load %arg4[%c1_146, %c0_147, %c0_148] : memref<2x1x32xf32, #tpu.memory_space<vmem>>, vector<1x1x32xf32>
    %213 = vector.shape_cast %212 : vector<1x1x32xf32> to vector<1x32xf32>
    %c1_149 = arith.constant 1 : index
    %c0_150 = arith.constant 0 : index
    %c0_151 = arith.constant 0 : index
    %214 = vector.load %arg5[%c1_149, %c0_150, %c0_151] : memref<2x1x32xf32, #tpu.memory_space<vmem>>, vector<1x1x32xf32>
    %215 = vector.shape_cast %214 : vector<1x1x32xf32> to vector<1x32xf32>
    %cst_152 = arith.constant dense<0.000000e+00> : vector<16xf32>
    %216 = vector.multi_reduction <add>, %211, %cst_152 [1] : vector<16x32xf32> to vector<16xf32>
    %217 = vector.shape_cast %216 : vector<16xf32> to vector<16x1xf32>
    %cst_153 = arith.constant 3.200000e+01 : f32
    %218 = vector.broadcast %cst_153 : f32 to vector<16x1xf32>
    %219 = arith.divf %217, %218 : vector<16x1xf32>
    %220 = vector.broadcast %219 : vector<16x1xf32> to vector<16x32xf32>
    %221 = arith.subf %211, %220 : vector<16x32xf32>
    %222 = arith.mulf %221, %221 : vector<16x32xf32>
    %cst_154 = arith.constant dense<0.000000e+00> : vector<16xf32>
    %223 = vector.multi_reduction <add>, %222, %cst_154 [1] : vector<16x32xf32> to vector<16xf32>
    %224 = vector.shape_cast %223 : vector<16xf32> to vector<16x1xf32>
    %cst_155 = arith.constant 3.200000e+01 : f32
    %225 = vector.broadcast %cst_155 : f32 to vector<16x1xf32>
    %226 = arith.divf %224, %225 : vector<16x1xf32>
    %cst_156 = arith.constant 9.99999974E-6 : f32
    %227 = vector.broadcast %cst_156 : f32 to vector<16x1xf32>
    %228 = arith.addf %226, %227 : vector<16x1xf32>
    %229 = math.rsqrt %228 : vector<16x1xf32>
    %230 = vector.broadcast %229 : vector<16x1xf32> to vector<16x32xf32>
    %231 = arith.mulf %221, %230 : vector<16x32xf32>
    %232 = vector.broadcast %213 : vector<1x32xf32> to vector<16x32xf32>
    %233 = arith.mulf %231, %232 : vector<16x32xf32>
    %234 = vector.broadcast %215 : vector<1x32xf32> to vector<16x32xf32>
    %235 = arith.addf %233, %234 : vector<16x32xf32>
    %cst_157 = arith.constant 0.000000e+00 : f32
    %236 = vector.broadcast %cst_157 : f32 to vector<16x32xf32>
    %c1_158 = arith.constant 1 : index
    %c0_159 = arith.constant 0 : index
    %c0_160 = arith.constant 0 : index
    %c0_161 = arith.constant 0 : index
    %237 = vector.load %arg6[%c1_158, %c0_159, %c0_160, %c0_161] : memref<2x4x32x8xf32, #tpu.memory_space<vmem>>, vector<1x1x32x8xf32>
    %238 = vector.shape_cast %237 : vector<1x1x32x8xf32> to vector<32x8xf32>
    %cst_162 = arith.constant dense<0.000000e+00> : vector<16x8xf32>
    %239 = tpu.matmul %235, %238, %cst_162 {dimension_numbers = #tpu.dot_dimension_numbers<[1], [0], [0], [1], [0, 0, 1, 1], [], []>} : vector<16x32xf32>, vector<32x8xf32>, vector<16x8xf32> -> vector<16x8xf32>
    %240 = arith.truncf %239 : vector<16x8xf32> to vector<16x8xbf16>
    %c1_163 = arith.constant 1 : index
    %c0_164 = arith.constant 0 : index
    %c0_165 = arith.constant 0 : index
    %c0_166 = arith.constant 0 : index
    %241 = vector.load %arg7[%c1_163, %c0_164, %c0_165, %c0_166] : memref<2x4x32x8xf32, #tpu.memory_space<vmem>>, vector<1x1x32x8xf32>
    %242 = vector.shape_cast %241 : vector<1x1x32x8xf32> to vector<32x8xf32>
    %cst_167 = arith.constant dense<0.000000e+00> : vector<16x8xf32>
    %243 = tpu.matmul %235, %242, %cst_167 {dimension_numbers = #tpu.dot_dimension_numbers<[1], [0], [0], [1], [0, 0, 1, 1], [], []>} : vector<16x32xf32>, vector<32x8xf32>, vector<16x8xf32> -> vector<16x8xf32>
    %244 = arith.truncf %243 : vector<16x8xf32> to vector<16x8xbf16>
    %c1_168 = arith.constant 1 : index
    %c0_169 = arith.constant 0 : index
    %c0_170 = arith.constant 0 : index
    %c0_171 = arith.constant 0 : index
    %245 = vector.load %arg8[%c1_168, %c0_169, %c0_170, %c0_171] : memref<2x4x32x8xf32, #tpu.memory_space<vmem>>, vector<1x1x32x8xf32>
    %246 = vector.shape_cast %245 : vector<1x1x32x8xf32> to vector<32x8xf32>
    %cst_172 = arith.constant dense<0.000000e+00> : vector<16x8xf32>
    %247 = tpu.matmul %235, %246, %cst_172 {dimension_numbers = #tpu.dot_dimension_numbers<[1], [0], [0], [1], [0, 0, 1, 1], [], []>} : vector<16x32xf32>, vector<32x8xf32>, vector<16x8xf32> -> vector<16x8xf32>
    %248 = arith.truncf %247 : vector<16x8xf32> to vector<16x8xbf16>
    %cst_173 = arith.constant dense<0.000000e+00> : vector<16x16xf32>
    %249 = tpu.matmul %240, %244, %cst_173 {dimension_numbers = #tpu.dot_dimension_numbers<[1], [1], [0], [0], [0, 0, 1, 0], [], []>} : vector<16x8xbf16>, vector<16x8xbf16>, vector<16x16xf32> -> vector<16x16xf32>
    %cst_174 = arith.constant 0.353553385 : f32
    %250 = vector.broadcast %cst_174 : f32 to vector<16x16xf32>
    %251 = arith.mulf %249, %250 : vector<16x16xf32>
    %252 = arith.addf %251, %10 : vector<16x16xf32>
    %cst_175 = arith.constant dense<0xFF800000> : vector<16xf32>
    %253 = vector.multi_reduction <maximumf>, %252, %cst_175 [1] : vector<16x16xf32> to vector<16xf32>
    %254 = vector.shape_cast %253 : vector<16xf32> to vector<16x1xf32>
    %255 = vector.broadcast %254 : vector<16x1xf32> to vector<16x16xf32>
    %256 = arith.subf %252, %255 : vector<16x16xf32>
    %257 = math.exp %256 : vector<16x16xf32>
    %cst_176 = arith.constant dense<0.000000e+00> : vector<16xf32>
    %258 = vector.multi_reduction <add>, %257, %cst_176 [1] : vector<16x16xf32> to vector<16xf32>
    %259 = vector.shape_cast %258 : vector<16xf32> to vector<16x1xf32>
    %260 = tpu.reciprocal %259 {approx = true} : vector<16x1xf32> -> vector<16x1xf32>
    %261 = vector.broadcast %260 : vector<16x1xf32> to vector<16x16xf32>
    %262 = arith.mulf %257, %261 : vector<16x16xf32>
    %263 = arith.truncf %262 : vector<16x16xf32> to vector<16x16xbf16>
    %cst_177 = arith.constant dense<0.000000e+00> : vector<16x8xf32>
    %264 = tpu.matmul %263, %248, %cst_177 {dimension_numbers = #tpu.dot_dimension_numbers<[1], [0], [0], [1], [0, 0, 1, 1], [], []>} : vector<16x16xbf16>, vector<16x8xbf16>, vector<16x8xf32> -> vector<16x8xf32>
    %c1_178 = arith.constant 1 : index
    %c0_179 = arith.constant 0 : index
    %c0_180 = arith.constant 0 : index
    %c0_181 = arith.constant 0 : index
    %265 = vector.load %arg9[%c1_178, %c0_179, %c0_180, %c0_181] : memref<2x4x8x32xf32, #tpu.memory_space<vmem>>, vector<1x1x8x32xf32>
    %266 = vector.shape_cast %265 : vector<1x1x8x32xf32> to vector<8x32xf32>
    %cst_182 = arith.constant dense<0.000000e+00> : vector<16x32xf32>
    %267 = tpu.matmul %264, %266, %cst_182 {dimension_numbers = #tpu.dot_dimension_numbers<[1], [0], [0], [1], [0, 0, 1, 1], [], []>} : vector<16x8xf32>, vector<8x32xf32>, vector<16x32xf32> -> vector<16x32xf32>
    %268 = arith.addf %236, %267 : vector<16x32xf32>
    %c1_183 = arith.constant 1 : index
    %c1_184 = arith.constant 1 : index
    %c0_185 = arith.constant 0 : index
    %c0_186 = arith.constant 0 : index
    %269 = vector.load %arg6[%c1_183, %c1_184, %c0_185, %c0_186] : memref<2x4x32x8xf32, #tpu.memory_space<vmem>>, vector<1x1x32x8xf32>
    %270 = vector.shape_cast %269 : vector<1x1x32x8xf32> to vector<32x8xf32>
    %cst_187 = arith.constant dense<0.000000e+00> : vector<16x8xf32>
    %271 = tpu.matmul %235, %270, %cst_187 {dimension_numbers = #tpu.dot_dimension_numbers<[1], [0], [0], [1], [0, 0, 1, 1], [], []>} : vector<16x32xf32>, vector<32x8xf32>, vector<16x8xf32> -> vector<16x8xf32>
    %272 = arith.truncf %271 : vector<16x8xf32> to vector<16x8xbf16>
    %c1_188 = arith.constant 1 : index
    %c1_189 = arith.constant 1 : index
    %c0_190 = arith.constant 0 : index
    %c0_191 = arith.constant 0 : index
    %273 = vector.load %arg7[%c1_188, %c1_189, %c0_190, %c0_191] : memref<2x4x32x8xf32, #tpu.memory_space<vmem>>, vector<1x1x32x8xf32>
    %274 = vector.shape_cast %273 : vector<1x1x32x8xf32> to vector<32x8xf32>
    %cst_192 = arith.constant dense<0.000000e+00> : vector<16x8xf32>
    %275 = tpu.matmul %235, %274, %cst_192 {dimension_numbers = #tpu.dot_dimension_numbers<[1], [0], [0], [1], [0, 0, 1, 1], [], []>} : vector<16x32xf32>, vector<32x8xf32>, vector<16x8xf32> -> vector<16x8xf32>
    %276 = arith.truncf %275 : vector<16x8xf32> to vector<16x8xbf16>
    %c1_193 = arith.constant 1 : index
    %c1_194 = arith.constant 1 : index
    %c0_195 = arith.constant 0 : index
    %c0_196 = arith.constant 0 : index
    %277 = vector.load %arg8[%c1_193, %c1_194, %c0_195, %c0_196] : memref<2x4x32x8xf32, #tpu.memory_space<vmem>>, vector<1x1x32x8xf32>
    %278 = vector.shape_cast %277 : vector<1x1x32x8xf32> to vector<32x8xf32>
    %cst_197 = arith.constant dense<0.000000e+00> : vector<16x8xf32>
    %279 = tpu.matmul %235, %278, %cst_197 {dimension_numbers = #tpu.dot_dimension_numbers<[1], [0], [0], [1], [0, 0, 1, 1], [], []>} : vector<16x32xf32>, vector<32x8xf32>, vector<16x8xf32> -> vector<16x8xf32>
    %280 = arith.truncf %279 : vector<16x8xf32> to vector<16x8xbf16>
    %cst_198 = arith.constant dense<0.000000e+00> : vector<16x16xf32>
    %281 = tpu.matmul %272, %276, %cst_198 {dimension_numbers = #tpu.dot_dimension_numbers<[1], [1], [0], [0], [0, 0, 1, 0], [], []>} : vector<16x8xbf16>, vector<16x8xbf16>, vector<16x16xf32> -> vector<16x16xf32>
    %cst_199 = arith.constant 0.353553385 : f32
    %282 = vector.broadcast %cst_199 : f32 to vector<16x16xf32>
    %283 = arith.mulf %281, %282 : vector<16x16xf32>
    %284 = arith.addf %283, %10 : vector<16x16xf32>
    %cst_200 = arith.constant dense<0xFF800000> : vector<16xf32>
    %285 = vector.multi_reduction <maximumf>, %284, %cst_200 [1] : vector<16x16xf32> to vector<16xf32>
    %286 = vector.shape_cast %285 : vector<16xf32> to vector<16x1xf32>
    %287 = vector.broadcast %286 : vector<16x1xf32> to vector<16x16xf32>
    %288 = arith.subf %284, %287 : vector<16x16xf32>
    %289 = math.exp %288 : vector<16x16xf32>
    %cst_201 = arith.constant dense<0.000000e+00> : vector<16xf32>
    %290 = vector.multi_reduction <add>, %289, %cst_201 [1] : vector<16x16xf32> to vector<16xf32>
    %291 = vector.shape_cast %290 : vector<16xf32> to vector<16x1xf32>
    %292 = tpu.reciprocal %291 {approx = true} : vector<16x1xf32> -> vector<16x1xf32>
    %293 = vector.broadcast %292 : vector<16x1xf32> to vector<16x16xf32>
    %294 = arith.mulf %289, %293 : vector<16x16xf32>
    %295 = arith.truncf %294 : vector<16x16xf32> to vector<16x16xbf16>
    %cst_202 = arith.constant dense<0.000000e+00> : vector<16x8xf32>
    %296 = tpu.matmul %295, %280, %cst_202 {dimension_numbers = #tpu.dot_dimension_numbers<[1], [0], [0], [1], [0, 0, 1, 1], [], []>} : vector<16x16xbf16>, vector<16x8xbf16>, vector<16x8xf32> -> vector<16x8xf32>
    %c1_203 = arith.constant 1 : index
    %c1_204 = arith.constant 1 : index
    %c0_205 = arith.constant 0 : index
    %c0_206 = arith.constant 0 : index
    %297 = vector.load %arg9[%c1_203, %c1_204, %c0_205, %c0_206] : memref<2x4x8x32xf32, #tpu.memory_space<vmem>>, vector<1x1x8x32xf32>
    %298 = vector.shape_cast %297 : vector<1x1x8x32xf32> to vector<8x32xf32>
    %cst_207 = arith.constant dense<0.000000e+00> : vector<16x32xf32>
    %299 = tpu.matmul %296, %298, %cst_207 {dimension_numbers = #tpu.dot_dimension_numbers<[1], [0], [0], [1], [0, 0, 1, 1], [], []>} : vector<16x8xf32>, vector<8x32xf32>, vector<16x32xf32> -> vector<16x32xf32>
    %300 = arith.addf %268, %299 : vector<16x32xf32>
    %c1_208 = arith.constant 1 : index
    %c2_209 = arith.constant 2 : index
    %c0_210 = arith.constant 0 : index
    %c0_211 = arith.constant 0 : index
    %301 = vector.load %arg6[%c1_208, %c2_209, %c0_210, %c0_211] : memref<2x4x32x8xf32, #tpu.memory_space<vmem>>, vector<1x1x32x8xf32>
    %302 = vector.shape_cast %301 : vector<1x1x32x8xf32> to vector<32x8xf32>
    %cst_212 = arith.constant dense<0.000000e+00> : vector<16x8xf32>
    %303 = tpu.matmul %235, %302, %cst_212 {dimension_numbers = #tpu.dot_dimension_numbers<[1], [0], [0], [1], [0, 0, 1, 1], [], []>} : vector<16x32xf32>, vector<32x8xf32>, vector<16x8xf32> -> vector<16x8xf32>
    %304 = arith.truncf %303 : vector<16x8xf32> to vector<16x8xbf16>
    %c1_213 = arith.constant 1 : index
    %c2_214 = arith.constant 2 : index
    %c0_215 = arith.constant 0 : index
    %c0_216 = arith.constant 0 : index
    %305 = vector.load %arg7[%c1_213, %c2_214, %c0_215, %c0_216] : memref<2x4x32x8xf32, #tpu.memory_space<vmem>>, vector<1x1x32x8xf32>
    %306 = vector.shape_cast %305 : vector<1x1x32x8xf32> to vector<32x8xf32>
    %cst_217 = arith.constant dense<0.000000e+00> : vector<16x8xf32>
    %307 = tpu.matmul %235, %306, %cst_217 {dimension_numbers = #tpu.dot_dimension_numbers<[1], [0], [0], [1], [0, 0, 1, 1], [], []>} : vector<16x32xf32>, vector<32x8xf32>, vector<16x8xf32> -> vector<16x8xf32>
    %308 = arith.truncf %307 : vector<16x8xf32> to vector<16x8xbf16>
    %c1_218 = arith.constant 1 : index
    %c2_219 = arith.constant 2 : index
    %c0_220 = arith.constant 0 : index
    %c0_221 = arith.constant 0 : index
    %309 = vector.load %arg8[%c1_218, %c2_219, %c0_220, %c0_221] : memref<2x4x32x8xf32, #tpu.memory_space<vmem>>, vector<1x1x32x8xf32>
    %310 = vector.shape_cast %309 : vector<1x1x32x8xf32> to vector<32x8xf32>
    %cst_222 = arith.constant dense<0.000000e+00> : vector<16x8xf32>
    %311 = tpu.matmul %235, %310, %cst_222 {dimension_numbers = #tpu.dot_dimension_numbers<[1], [0], [0], [1], [0, 0, 1, 1], [], []>} : vector<16x32xf32>, vector<32x8xf32>, vector<16x8xf32> -> vector<16x8xf32>
    %312 = arith.truncf %311 : vector<16x8xf32> to vector<16x8xbf16>
    %cst_223 = arith.constant dense<0.000000e+00> : vector<16x16xf32>
    %313 = tpu.matmul %304, %308, %cst_223 {dimension_numbers = #tpu.dot_dimension_numbers<[1], [1], [0], [0], [0, 0, 1, 0], [], []>} : vector<16x8xbf16>, vector<16x8xbf16>, vector<16x16xf32> -> vector<16x16xf32>
    %cst_224 = arith.constant 0.353553385 : f32
    %314 = vector.broadcast %cst_224 : f32 to vector<16x16xf32>
    %315 = arith.mulf %313, %314 : vector<16x16xf32>
    %316 = arith.addf %315, %10 : vector<16x16xf32>
    %cst_225 = arith.constant dense<0xFF800000> : vector<16xf32>
    %317 = vector.multi_reduction <maximumf>, %316, %cst_225 [1] : vector<16x16xf32> to vector<16xf32>
    %318 = vector.shape_cast %317 : vector<16xf32> to vector<16x1xf32>
    %319 = vector.broadcast %318 : vector<16x1xf32> to vector<16x16xf32>
    %320 = arith.subf %316, %319 : vector<16x16xf32>
    %321 = math.exp %320 : vector<16x16xf32>
    %cst_226 = arith.constant dense<0.000000e+00> : vector<16xf32>
    %322 = vector.multi_reduction <add>, %321, %cst_226 [1] : vector<16x16xf32> to vector<16xf32>
    %323 = vector.shape_cast %322 : vector<16xf32> to vector<16x1xf32>
    %324 = tpu.reciprocal %323 {approx = true} : vector<16x1xf32> -> vector<16x1xf32>
    %325 = vector.broadcast %324 : vector<16x1xf32> to vector<16x16xf32>
    %326 = arith.mulf %321, %325 : vector<16x16xf32>
    %327 = arith.truncf %326 : vector<16x16xf32> to vector<16x16xbf16>
    %cst_227 = arith.constant dense<0.000000e+00> : vector<16x8xf32>
    %328 = tpu.matmul %327, %312, %cst_227 {dimension_numbers = #tpu.dot_dimension_numbers<[1], [0], [0], [1], [0, 0, 1, 1], [], []>} : vector<16x16xbf16>, vector<16x8xbf16>, vector<16x8xf32> -> vector<16x8xf32>
    %c1_228 = arith.constant 1 : index
    %c2_229 = arith.constant 2 : index
    %c0_230 = arith.constant 0 : index
    %c0_231 = arith.constant 0 : index
    %329 = vector.load %arg9[%c1_228, %c2_229, %c0_230, %c0_231] : memref<2x4x8x32xf32, #tpu.memory_space<vmem>>, vector<1x1x8x32xf32>
    %330 = vector.shape_cast %329 : vector<1x1x8x32xf32> to vector<8x32xf32>
    %cst_232 = arith.constant dense<0.000000e+00> : vector<16x32xf32>
    %331 = tpu.matmul %328, %330, %cst_232 {dimension_numbers = #tpu.dot_dimension_numbers<[1], [0], [0], [1], [0, 0, 1, 1], [], []>} : vector<16x8xf32>, vector<8x32xf32>, vector<16x32xf32> -> vector<16x32xf32>
    %332 = arith.addf %300, %331 : vector<16x32xf32>
    %c1_233 = arith.constant 1 : index
    %c3_234 = arith.constant 3 : index
    %c0_235 = arith.constant 0 : index
    %c0_236 = arith.constant 0 : index
    %333 = vector.load %arg6[%c1_233, %c3_234, %c0_235, %c0_236] : memref<2x4x32x8xf32, #tpu.memory_space<vmem>>, vector<1x1x32x8xf32>
    %334 = vector.shape_cast %333 : vector<1x1x32x8xf32> to vector<32x8xf32>
    %cst_237 = arith.constant dense<0.000000e+00> : vector<16x8xf32>
    %335 = tpu.matmul %235, %334, %cst_237 {dimension_numbers = #tpu.dot_dimension_numbers<[1], [0], [0], [1], [0, 0, 1, 1], [], []>} : vector<16x32xf32>, vector<32x8xf32>, vector<16x8xf32> -> vector<16x8xf32>
    %336 = arith.truncf %335 : vector<16x8xf32> to vector<16x8xbf16>
    %c1_238 = arith.constant 1 : index
    %c3_239 = arith.constant 3 : index
    %c0_240 = arith.constant 0 : index
    %c0_241 = arith.constant 0 : index
    %337 = vector.load %arg7[%c1_238, %c3_239, %c0_240, %c0_241] : memref<2x4x32x8xf32, #tpu.memory_space<vmem>>, vector<1x1x32x8xf32>
    %338 = vector.shape_cast %337 : vector<1x1x32x8xf32> to vector<32x8xf32>
    %cst_242 = arith.constant dense<0.000000e+00> : vector<16x8xf32>
    %339 = tpu.matmul %235, %338, %cst_242 {dimension_numbers = #tpu.dot_dimension_numbers<[1], [0], [0], [1], [0, 0, 1, 1], [], []>} : vector<16x32xf32>, vector<32x8xf32>, vector<16x8xf32> -> vector<16x8xf32>
    %340 = arith.truncf %339 : vector<16x8xf32> to vector<16x8xbf16>
    %c1_243 = arith.constant 1 : index
    %c3_244 = arith.constant 3 : index
    %c0_245 = arith.constant 0 : index
    %c0_246 = arith.constant 0 : index
    %341 = vector.load %arg8[%c1_243, %c3_244, %c0_245, %c0_246] : memref<2x4x32x8xf32, #tpu.memory_space<vmem>>, vector<1x1x32x8xf32>
    %342 = vector.shape_cast %341 : vector<1x1x32x8xf32> to vector<32x8xf32>
    %cst_247 = arith.constant dense<0.000000e+00> : vector<16x8xf32>
    %343 = tpu.matmul %235, %342, %cst_247 {dimension_numbers = #tpu.dot_dimension_numbers<[1], [0], [0], [1], [0, 0, 1, 1], [], []>} : vector<16x32xf32>, vector<32x8xf32>, vector<16x8xf32> -> vector<16x8xf32>
    %344 = arith.truncf %343 : vector<16x8xf32> to vector<16x8xbf16>
    %cst_248 = arith.constant dense<0.000000e+00> : vector<16x16xf32>
    %345 = tpu.matmul %336, %340, %cst_248 {dimension_numbers = #tpu.dot_dimension_numbers<[1], [1], [0], [0], [0, 0, 1, 0], [], []>} : vector<16x8xbf16>, vector<16x8xbf16>, vector<16x16xf32> -> vector<16x16xf32>
    %cst_249 = arith.constant 0.353553385 : f32
    %346 = vector.broadcast %cst_249 : f32 to vector<16x16xf32>
    %347 = arith.mulf %345, %346 : vector<16x16xf32>
    %348 = arith.addf %347, %10 : vector<16x16xf32>
    %cst_250 = arith.constant dense<0xFF800000> : vector<16xf32>
    %349 = vector.multi_reduction <maximumf>, %348, %cst_250 [1] : vector<16x16xf32> to vector<16xf32>
    %350 = vector.shape_cast %349 : vector<16xf32> to vector<16x1xf32>
    %351 = vector.broadcast %350 : vector<16x1xf32> to vector<16x16xf32>
    %352 = arith.subf %348, %351 : vector<16x16xf32>
    %353 = math.exp %352 : vector<16x16xf32>
    %cst_251 = arith.constant dense<0.000000e+00> : vector<16xf32>
    %354 = vector.multi_reduction <add>, %353, %cst_251 [1] : vector<16x16xf32> to vector<16xf32>
    %355 = vector.shape_cast %354 : vector<16xf32> to vector<16x1xf32>
    %356 = tpu.reciprocal %355 {approx = true} : vector<16x1xf32> -> vector<16x1xf32>
    %357 = vector.broadcast %356 : vector<16x1xf32> to vector<16x16xf32>
    %358 = arith.mulf %353, %357 : vector<16x16xf32>
    %359 = arith.truncf %358 : vector<16x16xf32> to vector<16x16xbf16>
    %cst_252 = arith.constant dense<0.000000e+00> : vector<16x8xf32>
    %360 = tpu.matmul %359, %344, %cst_252 {dimension_numbers = #tpu.dot_dimension_numbers<[1], [0], [0], [1], [0, 0, 1, 1], [], []>} : vector<16x16xbf16>, vector<16x8xbf16>, vector<16x8xf32> -> vector<16x8xf32>
    %c1_253 = arith.constant 1 : index
    %c3_254 = arith.constant 3 : index
    %c0_255 = arith.constant 0 : index
    %c0_256 = arith.constant 0 : index
    %361 = vector.load %arg9[%c1_253, %c3_254, %c0_255, %c0_256] : memref<2x4x8x32xf32, #tpu.memory_space<vmem>>, vector<1x1x8x32xf32>
    %362 = vector.shape_cast %361 : vector<1x1x8x32xf32> to vector<8x32xf32>
    %cst_257 = arith.constant dense<0.000000e+00> : vector<16x32xf32>
    %363 = tpu.matmul %360, %362, %cst_257 {dimension_numbers = #tpu.dot_dimension_numbers<[1], [0], [0], [1], [0, 0, 1, 1], [], []>} : vector<16x8xf32>, vector<8x32xf32>, vector<16x32xf32> -> vector<16x32xf32>
    %364 = arith.addf %332, %363 : vector<16x32xf32>
    %365 = arith.addf %211, %364 : vector<16x32xf32>
    %c1_258 = arith.constant 1 : index
    %c0_259 = arith.constant 0 : index
    %c0_260 = arith.constant 0 : index
    %366 = vector.load %arg10[%c1_258, %c0_259, %c0_260] : memref<2x1x32xf32, #tpu.memory_space<vmem>>, vector<1x1x32xf32>
    %367 = vector.shape_cast %366 : vector<1x1x32xf32> to vector<1x32xf32>
    %368 = vector.broadcast %367 : vector<1x32xf32> to vector<16x32xf32>
    %369 = arith.addf %365, %368 : vector<16x32xf32>
    %c1_261 = arith.constant 1 : index
    %c0_262 = arith.constant 0 : index
    %c0_263 = arith.constant 0 : index
    %370 = vector.load %arg11[%c1_261, %c0_262, %c0_263] : memref<2x1x32xf32, #tpu.memory_space<vmem>>, vector<1x1x32xf32>
    %371 = vector.shape_cast %370 : vector<1x1x32xf32> to vector<1x32xf32>
    %c1_264 = arith.constant 1 : index
    %c0_265 = arith.constant 0 : index
    %c0_266 = arith.constant 0 : index
    %372 = vector.load %arg12[%c1_264, %c0_265, %c0_266] : memref<2x1x32xf32, #tpu.memory_space<vmem>>, vector<1x1x32xf32>
    %373 = vector.shape_cast %372 : vector<1x1x32xf32> to vector<1x32xf32>
    %cst_267 = arith.constant dense<0.000000e+00> : vector<16xf32>
    %374 = vector.multi_reduction <add>, %369, %cst_267 [1] : vector<16x32xf32> to vector<16xf32>
    %375 = vector.shape_cast %374 : vector<16xf32> to vector<16x1xf32>
    %cst_268 = arith.constant 3.200000e+01 : f32
    %376 = vector.broadcast %cst_268 : f32 to vector<16x1xf32>
    %377 = arith.divf %375, %376 : vector<16x1xf32>
    %378 = vector.broadcast %377 : vector<16x1xf32> to vector<16x32xf32>
    %379 = arith.subf %369, %378 : vector<16x32xf32>
    %380 = arith.mulf %379, %379 : vector<16x32xf32>
    %cst_269 = arith.constant dense<0.000000e+00> : vector<16xf32>
    %381 = vector.multi_reduction <add>, %380, %cst_269 [1] : vector<16x32xf32> to vector<16xf32>
    %382 = vector.shape_cast %381 : vector<16xf32> to vector<16x1xf32>
    %cst_270 = arith.constant 3.200000e+01 : f32
    %383 = vector.broadcast %cst_270 : f32 to vector<16x1xf32>
    %384 = arith.divf %382, %383 : vector<16x1xf32>
    %cst_271 = arith.constant 9.99999974E-6 : f32
    %385 = vector.broadcast %cst_271 : f32 to vector<16x1xf32>
    %386 = arith.addf %384, %385 : vector<16x1xf32>
    %387 = math.rsqrt %386 : vector<16x1xf32>
    %388 = vector.broadcast %387 : vector<16x1xf32> to vector<16x32xf32>
    %389 = arith.mulf %379, %388 : vector<16x32xf32>
    %390 = vector.broadcast %371 : vector<1x32xf32> to vector<16x32xf32>
    %391 = arith.mulf %389, %390 : vector<16x32xf32>
    %392 = vector.broadcast %373 : vector<1x32xf32> to vector<16x32xf32>
    %393 = arith.addf %391, %392 : vector<16x32xf32>
    %c1_272 = arith.constant 1 : index
    %c0_273 = arith.constant 0 : index
    %c0_274 = arith.constant 0 : index
    %394 = vector.load %arg13[%c1_272, %c0_273, %c0_274] : memref<2x32x128xf32, #tpu.memory_space<vmem>>, vector<1x32x128xf32>
    %395 = vector.shape_cast %394 : vector<1x32x128xf32> to vector<32x128xf32>
    %cst_275 = arith.constant dense<0.000000e+00> : vector<16x128xf32>
    %396 = tpu.matmul %393, %395, %cst_275 {dimension_numbers = #tpu.dot_dimension_numbers<[1], [0], [0], [1], [0, 0, 1, 1], [], []>} : vector<16x32xf32>, vector<32x128xf32>, vector<16x128xf32> -> vector<16x128xf32>
    %c1_276 = arith.constant 1 : index
    %c0_277 = arith.constant 0 : index
    %c0_278 = arith.constant 0 : index
    %397 = vector.load %arg14[%c1_276, %c0_277, %c0_278] : memref<2x1x128xf32, #tpu.memory_space<vmem>>, vector<1x1x128xf32>
    %398 = vector.shape_cast %397 : vector<1x1x128xf32> to vector<1x128xf32>
    %399 = vector.broadcast %398 : vector<1x128xf32> to vector<16x128xf32>
    %400 = arith.addf %396, %399 : vector<16x128xf32>
    %cst_279 = arith.constant 0.000000e+00 : f32
    %401 = vector.broadcast %cst_279 : f32 to vector<16x128xf32>
    %402 = arith.maximumf %400, %401 : vector<16x128xf32>
    %c1_280 = arith.constant 1 : index
    %c0_281 = arith.constant 0 : index
    %c0_282 = arith.constant 0 : index
    %403 = vector.load %arg15[%c1_280, %c0_281, %c0_282] : memref<2x128x32xf32, #tpu.memory_space<vmem>>, vector<1x128x32xf32>
    %404 = vector.shape_cast %403 : vector<1x128x32xf32> to vector<128x32xf32>
    %cst_283 = arith.constant dense<0.000000e+00> : vector<16x32xf32>
    %405 = tpu.matmul %402, %404, %cst_283 {dimension_numbers = #tpu.dot_dimension_numbers<[1], [0], [0], [1], [0, 0, 1, 1], [], []>} : vector<16x128xf32>, vector<128x32xf32>, vector<16x32xf32> -> vector<16x32xf32>
    %c1_284 = arith.constant 1 : index
    %c0_285 = arith.constant 0 : index
    %c0_286 = arith.constant 0 : index
    %406 = vector.load %arg16[%c1_284, %c0_285, %c0_286] : memref<2x1x32xf32, #tpu.memory_space<vmem>>, vector<1x1x32xf32>
    %407 = vector.shape_cast %406 : vector<1x1x32xf32> to vector<1x32xf32>
    %408 = vector.broadcast %407 : vector<1x32xf32> to vector<16x32xf32>
    %409 = arith.addf %405, %408 : vector<16x32xf32>
    %cst_287 = arith.constant 0.000000e+00 : f32
    %410 = vector.broadcast %cst_287 : f32 to vector<16x32xf32>
    %411 = arith.maximumf %409, %410 : vector<16x32xf32>
    %412 = arith.addf %369, %411 : vector<16x32xf32>
    %c0_288 = arith.constant 0 : index
    %c0_289 = arith.constant 0 : index
    %413 = vector.load %arg17[%c0_288, %c0_289] : memref<1x32xf32, #tpu.memory_space<vmem>>, vector<1x32xf32>
    %c0_290 = arith.constant 0 : index
    %c0_291 = arith.constant 0 : index
    %414 = vector.load %arg18[%c0_290, %c0_291] : memref<1x32xf32, #tpu.memory_space<vmem>>, vector<1x32xf32>
    %cst_292 = arith.constant dense<0.000000e+00> : vector<16xf32>
    %415 = vector.multi_reduction <add>, %412, %cst_292 [1] : vector<16x32xf32> to vector<16xf32>
    %416 = vector.shape_cast %415 : vector<16xf32> to vector<16x1xf32>
    %cst_293 = arith.constant 3.200000e+01 : f32
    %417 = vector.broadcast %cst_293 : f32 to vector<16x1xf32>
    %418 = arith.divf %416, %417 : vector<16x1xf32>
    %419 = vector.broadcast %418 : vector<16x1xf32> to vector<16x32xf32>
    %420 = arith.subf %412, %419 : vector<16x32xf32>
    %421 = arith.mulf %420, %420 : vector<16x32xf32>
    %cst_294 = arith.constant dense<0.000000e+00> : vector<16xf32>
    %422 = vector.multi_reduction <add>, %421, %cst_294 [1] : vector<16x32xf32> to vector<16xf32>
    %423 = vector.shape_cast %422 : vector<16xf32> to vector<16x1xf32>
    %cst_295 = arith.constant 3.200000e+01 : f32
    %424 = vector.broadcast %cst_295 : f32 to vector<16x1xf32>
    %425 = arith.divf %423, %424 : vector<16x1xf32>
    %cst_296 = arith.constant 9.99999974E-6 : f32
    %426 = vector.broadcast %cst_296 : f32 to vector<16x1xf32>
    %427 = arith.addf %425, %426 : vector<16x1xf32>
    %428 = math.rsqrt %427 : vector<16x1xf32>
    %429 = vector.broadcast %428 : vector<16x1xf32> to vector<16x32xf32>
    %430 = arith.mulf %420, %429 : vector<16x32xf32>
    %431 = vector.broadcast %413 : vector<1x32xf32> to vector<16x32xf32>
    %432 = arith.mulf %430, %431 : vector<16x32xf32>
    %433 = vector.broadcast %414 : vector<1x32xf32> to vector<16x32xf32>
    %434 = arith.addf %432, %433 : vector<16x32xf32>
    %c0_297 = arith.constant 0 : index
    %c0_298 = arith.constant 0 : index
    %435 = vector.load %arg19[%c0_297, %c0_298] : memref<32x128xf32, #tpu.memory_space<vmem>>, vector<32x128xf32>
    %cst_299 = arith.constant dense<0.000000e+00> : vector<16x128xf32>
    %436 = tpu.matmul %434, %435, %cst_299 {dimension_numbers = #tpu.dot_dimension_numbers<[1], [0], [0], [1], [0, 0, 1, 1], [], []>} : vector<16x32xf32>, vector<32x128xf32>, vector<16x128xf32> -> vector<16x128xf32>
    %c0_300 = arith.constant 0 : index
    %c0_301 = arith.constant 0 : index
    %437 = vector.load %arg20[%c0_300, %c0_301] : memref<1x128xf32, #tpu.memory_space<vmem>>, vector<1x128xf32>
    %438 = vector.broadcast %437 : vector<1x128xf32> to vector<16x128xf32>
    %439 = arith.addf %436, %438 : vector<16x128xf32>
    %c0_302 = arith.constant 0 : index
    %c0_303 = arith.constant 0 : index
    %440 = vector.load %arg21[%c0_302, %c0_303] : memref<16x128xf32, #tpu.memory_space<vmem>>, vector<16x128xf32>
    tpu.vector_store %arg21[%c0_302, %c0_303], %439 {strides = array<i32>} : memref<16x128xf32, #tpu.memory_space<vmem>>, vector<16x128xf32>,
    return
  }
}

</mosaic_0001>

<bundles_post_ra>
// kernel: tpu_custom_call.1
= control target key start
LH: loop header
LB: loop body
LE: loop exit
PB: predicated region body
PF: predicated region fallthrough
CT: control target
= control target key end

     0   :  { %s3508_s0 = inlined_call_operand.vmem [shape: s32[16,1], index: 0, kind: input, shape index: {}]   ;;  %s3509_s1 = inlined_call_operand.vmem [shape: f32[64,32], index: 1, kind: input, shape index: {}]   ;;  %s3510_s2 = inlined_call_operand.vmem [shape: f32[16,32], index: 2, kind: input, shape index: {}]   ;;  %s3511_s3 = inlined_call_operand.vmem [shape: f32[16,16], index: 3, kind: input, shape index: {}]   ;;  %s3512_s4 = inlined_call_operand.vmem [shape: f32[2,1,32], index: 4, kind: input, shape index: {}]   ;;  %s3513_s5 = inlined_call_operand.vmem [shape: f32[2,1,32], index: 5, kind: input, shape index: {}]   ;;  %s3514_s6 = inlined_call_operand.vmem [shape: f32[2,4,32,8], index: 6, kind: input, shape index: {}]   ;;  %s3515_s7 = inlined_call_operand.vmem [shape: f32[2,4,32,8], index: 7, kind: input, shape index: {}]   ;;  %s3516_s8 = inlined_call_operand.vmem [shape: f32[2,4,32,8], index: 8, kind: input, shape index: {}]   ;;  %s3517_s9 = inlined_call_operand.vmem [shape: f32[2,4,8,32], index: 9, kind: input, shape index: {}]   ;;  %s3518_s10 = inlined_call_operand.vmem [shape: f32[2,1,32], index: 10, kind: input, shape index: {}]   ;;  %s3519_s11 = inlined_call_operand.vmem [shape: f32[2,1,32], index: 11, kind: input, shape index: {}]   ;;  %s3520_s12 = inlined_call_operand.vmem [shape: f32[2,1,32], index: 12, kind: input, shape index: {}]   ;;  %s3521_s13 = inlined_call_operand.vmem [shape: f32[2,32,128], index: 13, kind: input, shape index: {}]   ;;  %s3522_s14 = inlined_call_operand.vmem [shape: f32[2,1,128], index: 14, kind: input, shape index: {}]   ;;  %s3523_s15 = inlined_call_operand.vmem [shape: f32[2,128,32], index: 15, kind: input, shape index: {}]   ;;  %s3524_s16 = inlined_call_operand.vmem [shape: f32[2,1,32], index: 16, kind: input, shape index: {}]   ;;  %s3525_s17 = inlined_call_operand.vmem [shape: f32[1,32], index: 17, kind: input, shape index: {}]   ;;  %s3526_s18 = inlined_call_operand.vmem [shape: f32[1,32], index: 18, kind: input, shape index: {}]   ;;  %s3527_s19 = inlined_call_operand.vmem [shape: f32[32,128], index: 19, kind: input, shape index: {}]   ;;  %s3528_s20 = inlined_call_operand.vmem [shape: f32[1,128], index: 20, kind: input, shape index: {}]   ;;  %s3529_s21 = inlined_call_operand.hbm [shape: f32[16,128], index: 21, kind: output, shape index: {}]  }
   0x1   :  { %3537 = sst [smem:[#allocation5_spill]] %s3508_s0 }
   0x2   :  { %3538 = sst [smem:[#allocation6_spill]] %s3509_s1 }
   0x3   :  { %3539 = sst [smem:[#allocation7_spill]] %s3510_s2 }
   0x4   :  { %3540 = sst [smem:[#allocation8_spill]] %s3511_s3 }
   0x5   :  { %3541 = sst [smem:[#allocation9_spill]] %s3512_s4 }
   0x6   :  { %3542 = sst [smem:[#allocation10_spill]] %s3513_s5 }
   0x7   :  { %3543 = sst [smem:[#allocation11_spill]] %s3524_s16 }
   0x8   :  { %s3544_s26 = sld [smem:[#allocation5_spill]]  ;;  %v2494_v2 = vmov 0  }
   0x9   :  { %s3545_s16 = sld [smem:[#allocation6_spill]]  ;;  %2362 = vset.pattern.permute.xlu0 %v2494_v2 }
   0xe   :  { %v70_v0 = vld [vmem:[%s3544_s26] sm:$0xff]  ;;  %v71_v7 = vld [vmem:[%s3544_s26 + $0x8] sm:$0xff] }
   0xf   :  { %v93_v1 = vld [vmem:[%s3545_s16 + $0x38] sm:$0xff]  ;;  %v92_v3 = vld [vmem:[%s3545_s16 + $0x30] sm:$0xff]  ;;  %75 = vperm.xlu0 %2362, %v70_v0   ;;  %v91_v4 = vld [vmem:[%s3545_s16 + $0x28] sm:$0xff] }
  0x10   :  { %111 = vmatpush.msra.mxu0 %v93_v1  ;;  %v90_v5 = vld [vmem:[%s3545_s16 + $0x20] sm:$0xff]  ;;  %v89_v6 = vld [vmem:[%s3545_s16 + $0x18] sm:$0xff]  ;;  %v88_v8 = vld [vmem:[%s3545_s16 + $0x10] sm:$0xff] }
  0x12   :  { %112 = vmatpush.msra.mxu0 %v92_v3 }
  0x14   :  { %113 = vmatpush.msra.mxu0 %v91_v4 }
  0x16   :  { %114 = vmatpush.msra.mxu0 %v90_v5 }
  0x17   :  { %26 = vsyncpa [#allocation3], 0  ;;  %78 = vperm.xlu0 %2362, %v71_v7   ;;  %v87_v9 = vld [vmem:[%s3545_s16 + $0x8] sm:$0xff]  ;;  %v86_v10 = vld [vmem:[%s3545_s16] sm:$0xff]  ;;  %v72_v11 = vlaneseq  ;;  %vm96_vm0 = vcmask 523264   ;;  %v2495_v14 = vmov 0.0  }
  0x18   :  { %115 = vmatpush.msra.mxu0 %v89_v6  ;;  %s3546_s4 = sld [smem:[#allocation7_spill]]  ;;  %vm130_vm3 = vcmask 261120   ;;  %v2496_v26 = vmov 32.0   ;;  %v195_v43 = vld [vmem:[%s3514_s6 + $0x18] sm:$0xff]  ;;  %v194_v46 = vld [vmem:[%s3514_s6 + $0x10] sm:$0xff]  ;;  %v193_v49 = vld [vmem:[%s3514_s6 + $0x8] sm:$0xff] }
  0x19   :  { %v73_v12 = vand.u32 127, %v72_v11  ;;  %2380 = vrcp.f32 %v2496_v26  ;;  %v229_v44 = vld [vmem:[%s3515_s7 + $0x18] sm:$0xff]  ;;  %214 = vmatpush.msra.mxu1 %v195_v43  ;;  %v228_v47 = vld [vmem:[%s3515_s7 + $0x10] sm:$0xff]  ;;  %v227_v50 = vld [vmem:[%s3515_s7 + $0x8] sm:$0xff]  ;;  %s3547_s29 = sld [smem:[#allocation9_spill]]  ;;  %vm282_vm11 = vcmask 64512  }
  0x1a   :  { %116 = vmatpush.msra.mxu0 %v88_v8  ;;  %v257_v45 = vld [vmem:[%s3516_s8 + $0x18] sm:$0xff]  ;;  %v256_v48 = vld [vmem:[%s3516_s8 + $0x10] sm:$0xff]  ;;  %v255_v51 = vld [vmem:[%s3516_s8 + $0x8] sm:$0xff]  ;;  %s3549_s3 = sld [smem:[#allocation8_spill]]  ;;  %vm307_vm12 = vcmask 130048   ;;  %s2132_s28 = sshll.u32 %s3529_s21, 4  ;;  %s2133_s28 = int_to_ptr.hbm [resolvable:$true] %s2132_s28 }
  0x1b   :  { %270 = vmatpush.msra.mxu3 %v257_v45  ;;  %215 = vmatpush.msra.mxu1 %v194_v46  ;;  %v192_v52 = vld [vmem:[%s3514_s6] sm:$0xff]  ;;  %v2159_v58 = vld [vmem:[%s3514_s6 + $0x38] sm:$0xff]  ;;  %v2158_v60 = vld [vmem:[%s3514_s6 + $0x30] sm:$0xff]  ;;  %s3550_s30 = sld [smem:[#allocation11_spill]]  ;;  %s2499_s26 = smov 8  }
  0x1c   :  { %117 = vmatpush.msra.mxu0 %v87_v9  ;;  %v226_v53 = vld [vmem:[%s3515_s7] sm:$0xff]  ;;  %v2713_v59 = vld [vmem:[%s3515_s7 + $0x38] sm:$0xff]  ;;  %v2722_v61 = vld [vmem:[%s3515_s7 + $0x30] sm:$0xff] }
  0x1d   :  { %271 = vmatpush.msra.mxu3 %v256_v48  ;;  %216 = vmatpush.msra.mxu1 %v193_v49  ;;  %v254_v54 = vld [vmem:[%s3516_s8] sm:$0xff]  ;;  %v2157_v63 = vld [vmem:[%s3514_s6 + $0x28] sm:$0xff] }
  0x1e   :  { %118 = vmatpush.msra.mxu0 %v86_v10  ;;  %v94_v18 = vld [vmem:[%s3546_s4] sm:$0xff]  ;;  %v95_v22 = vld [vmem:[%s3546_s4 + $0x8] sm:$0xff]  ;;  %s3548_s4 = sld [smem:[#allocation10_spill]] }
  0x1f   :  { %v2381_v27 = vpop.eup %2380  ;;  %272 = vmatpush.msra.mxu3 %v255_v51  ;;  %217 = vmatpush.msra.mxu1 %v192_v52  ;;  %v2730_v0 = vld [vmem:[%s3515_s7 + $0x28] sm:$0xff]  ;;  %v2156_v2 = vld [vmem:[%s3514_s6 + $0x20] sm:$0xff] }
  0x20   :  { %v138_v28 = vmul.f32 32.0, %v2381_v27  ;;  %vm142_vm4 = vweird.f32 %v2381_v27  ;;  %242 = vmatpush.msrb.mxu0 %v229_v44  ;;  %v2740_v3 = vld [vmem:[%s3515_s7 + $0x20] sm:$0xff] }
  0x21   :  { %273 = vmatpush.msra.mxu3 %v254_v54  ;;  %v2168_v43 = vld [vmem:[%s3516_s8 + $0x20] sm:$0xff] }
  0x22   :  { %v139_v29 = vsub.f32 1.0, %v138_v28  ;;  %243 = vmatpush.msrb.mxu0 %v228_v47  ;;  %v2799_v45 = vld [vmem:[%s3549_s3] sm:$0xff] }
  0x23   :  { %366 = vmatpush.msrb.mxu3 %v2159_v58 }
  0x24   :  { %v140_v30 = vmul.f32 %v2381_v27, %v139_v29  ;;  %244 = vmatpush.msrb.mxu0 %v227_v50  ;;  %v2806_v50 = vld [vmem:[%s3549_s3 + $0x8] sm:$0xff] }
  0x25   :  { %367 = vmatpush.msrb.mxu3 %v2158_v60 }
  0x26   :  { %v141_v31 = vadd.f32 %v2381_v27, %v140_v30  ;;  %245 = vmatpush.msrb.mxu0 %v226_v53 }
  0x27   :  { %368 = vmatpush.msrb.mxu3 %v2157_v63 }
  0x28   :  { %v2654_v32 = vsel %vm142_vm4, %v2381_v27, %v141_v31 }
  0x29   :  { %369 = vmatpush.msrb.mxu3 %v2156_v2 }
  0x81   :  { %v76_v13 = vpop.permute.xlu0 %75 }
  0x82   :  { %vm80_vm1 = vcmp.eq.s32.totalorder %v73_v12, %v76_v13  ;;  %v2363_v13 = vld [vmem:[%s3547_s29] ss:$0 sm:$0xff] }
  0x83   :  { %v2144_v15 = vsel %vm80_vm1, 1.0, %v2495_v14 }
  0x84   :  { %2146 = vmatmul.msk.f32.vlgmr.msra.gmra.mxu0 %vm96_vm0, %v2144_v15 }
  0x85   :  { %395 = vmatpush.msra.mxu0 %v2713_v59 }
  0x87   :  { %396 = vmatpush.msra.mxu0 %v2722_v61 }
  0x89   :  { %v79_v16 = vpop.permute.xlu0 %78  ;;  %397 = vmatpush.msra.mxu0 %v2730_v0 }
  0x8a   :  { %vm81_vm2 = vcmp.eq.s32.totalorder %v73_v12, %v79_v16  ;;  %v2364_v16 = vld [vmem:[%s3548_s4] ss:$0 sm:$0xff] }
  0x8b   :  { %v2145_v17 = vsel %vm81_vm2, 1.0, %v2495_v14  ;;  %398 = vmatpush.msra.mxu0 %v2740_v3 }
  0x8c   :  { %2147 = vmatmul.msk.f32.gmra.mxu0 %vm96_vm0, %v2145_v17 }
 0x101   :  { %v120_v19 = vpop.f32.mrf.mxu0 }
 0x102   :  { %v2643_v20 = vadd.f32 %v120_v19, %v94_v18 }
 0x104   :  { %v131_v21 = vsel %vm130_vm3, %v2643_v20, 0.0 }
 0x105   :  { %132 = vadd.xlane.f32.xlu1 %v131_v21 }
 0x109   :  { %v123_v23 = vpop.f32.mrf.mxu0 }
 0x10a   :  { %v2650_v24 = vadd.f32 %v123_v23, %v95_v22 }
 0x10c   :  { %v134_v25 = vsel %vm130_vm3, %v2650_v24, 0.0 }
 0x10d   :  { %135 = vadd.xlane.f32.xlu1 %v134_v25 }
 0x178   :  { %v133_v33 = vpop.xlane.xlu1 %132 }
 0x179   :  { %v144_v34 = vmul.f32 %v2654_v32, %v133_v33 }
 0x17b   :  { %v2658_v35 = vsub.f32 %v2643_v20, %v144_v34 }
 0x17d   :  { %v148_v36 = vmul.f32 %v2658_v35, %v2658_v35 }
 0x17f   :  { %v150_v37 = vsel %vm130_vm3, %v148_v36, 0.0 }
 0x180   :  { %151 = vadd.xlane.f32.xlu2 %v150_v37  ;;  %v136_v38 = vpop.xlane.xlu1 %135  ;;  %v2170_v37 = vld [vmem:[%s3516_s8 + $0x30] sm:$0xff] }
 0x181   :  { %v145_v39 = vmul.f32 %v2654_v32, %v136_v38 }
 0x183   :  { %v2665_v40 = vsub.f32 %v2650_v24, %v145_v39  ;;  %v2169_v39 = vld [vmem:[%s3516_s8 + $0x28] sm:$0xff] }
 0x185   :  { %v149_v41 = vmul.f32 %v2665_v40, %v2665_v40 }
 0x187   :  { %v153_v42 = vsel %vm130_vm3, %v149_v41, 0.0 }
 0x188   :  { %154 = vadd.xlane.f32.xlu2 %v153_v42 }
 0x1f3   :  { %v152_v55 = vpop.xlane.xlu2 %151 }
 0x1f4   :  { %v156_v56 = vmul.f32 %v152_v55, %v2654_v32 }
 0x1f6   :  { %v158_v57 = vadd.f32 1e-05, %v156_v56 }
 0x1f8   :  { %2382 = vrsqrt.f32 %v158_v57  ;;  %vm166_vm6 = vweird.f32 %v158_v57 }
 0x1fb   :  { %v155_v62 = vpop.xlane.xlu2 %154 }
 0x1fc   :  { %v157_v1 = vmul.f32 %v155_v62, %v2654_v32 }
 0x1fe   :  { %v2383_v4 = vpop.eup %2382  ;;  %v159_v5 = vadd.f32 1e-05, %v157_v1 }
 0x1ff   :  { %v161_v6 = vmul.f32 %v2383_v4, %v158_v57  ;;  %vm167_vm5 = vweird.f32 %v2383_v4 }
 0x200   :  { %2384 = vrsqrt.f32 %v159_v5  ;;  %vm168_vm7 = vmor %vm166_vm6, %vm167_vm5  ;;  %vm176_vm9 = vweird.f32 %v159_v5 }
 0x201   :  { %v162_v7 = vmul.f32 %v2383_v4, %v161_v6 }
 0x203   :  { %v163_v8 = vmul.f32 0.5, %v162_v7 }
 0x205   :  { %v164_v9 = vsub.f32 1.5, %v163_v8 }
 0x206   :  { %v2385_v10 = vpop.eup %2384 }
 0x207   :  { %v165_v11 = vmul.f32 %v2383_v4, %v164_v9  ;;  %v171_v12 = vmul.f32 %v2385_v10, %v159_v5  ;;  %vm177_vm8 = vweird.f32 %v2385_v10 }
 0x208   :  { %vm178_vm10 = vmor %vm176_vm9, %vm177_vm8 }
 0x209   :  { %v169_v14 = vsel %vm168_vm7, %v2383_v4, %v165_v11  ;;  %v172_v15 = vmul.f32 %v2385_v10, %v171_v12 }
 0x20a   :  { %v180_v17 = vmul.f32 %v169_v14, %v2658_v35  ;;  %v2171_v35 = vld [vmem:[%s3516_s8 + $0x38] sm:$0xff] }
 0x20b   :  { %v173_v18 = vmul.f32 0.5, %v172_v15 }
 0x20c   :  { %v185_v19 = vmul.f32 %v2363_v13, %v180_v17  ;;  %v2184_v17 = vld [vmem:[%s3514_s6 + $0x58] sm:$0xff] }
 0x20d   :  { %v174_v21 = vsub.f32 1.5, %v173_v18 }
 0x20e   :  { %v2751_v22 = vadd.f32 %v2364_v16, %v185_v19  ;;  %v2183_v19 = vld [vmem:[%s3514_s6 + $0x50] sm:$0xff] }
 0x20f   :  { %v175_v23 = vmul.f32 %v2385_v10, %v174_v21 }
 0x210   :  { %2148 = vmatmul.msk.f32.vlgmr.msra.gmra.mxu1 %vm130_vm3, %v2751_v22  ;;  %2150 = vmatmul.msk.f32.vlgmr.msrb.gmra.mxu0 %vm130_vm3, %v2751_v22 }
 0x211   :  { %v179_v25 = vsel %vm178_vm10, %v2385_v10, %v175_v23  ;;  %2152 = vmatmul.msk.f32.vlgmr.msra.gmra.mxu3 %vm130_vm3, %v2751_v22  ;;  %v348_v10 = vld [vmem:[%s3517_s9] sm:$0xff]  ;;  %v2182_v23 = vld [vmem:[%s3514_s6 + $0x48] sm:$0xff] }
 0x212   :  { %v181_v26 = vmul.f32 %v179_v25, %v2665_v40 }
 0x214   :  { %v186_v27 = vmul.f32 %v2363_v13, %v181_v26  ;;  %v2181_v26 = vld [vmem:[%s3514_s6 + $0x40] sm:$0xff] }
 0x216   :  { %v2760_v28 = vadd.f32 %v2364_v16, %v186_v27 }
 0x218   :  { %2149 = vmatmul.msk.f32.gmra.mxu1 %vm130_vm3, %v2760_v28  ;;  %2151 = vmatmul.msk.f32.gmra.mxu0 %vm130_vm3, %v2760_v28 }
 0x219   :  { %2153 = vmatmul.msk.f32.gmra.mxu3 %vm130_vm3, %v2760_v28 }
 0x220   :  { %2166 = vmatmul.msk.f32.vlgmr.msra.gmra.mxu0 %vm130_vm3, %v2751_v22 }
 0x221   :  { %2160 = vmatmul.msk.f32.vlgmr.msrb.gmra.mxu3 %vm130_vm3, %v2751_v22 }
 0x229   :  { %2161 = vmatmul.msk.f32.gmra.mxu3 %vm130_vm3, %v2760_v28 }
 0x28d   :  { %v247_v29 = vpop.f32.mrf.mxu0  ;;  %v219_v30 = vpop.f32.mrf.mxu1 }
 0x294   :  { %v275_v31 = vpop.f32.mrf.mxu3 }
 0x295   :  { %v250_v33 = vpop.f32.mrf.mxu0  ;;  %v222_v38 = vpop.f32.mrf.mxu1 }
 0x296   :  { %v253_v34 = vpack.c.bf16 %v250_v33, %v247_v29  ;;  %v225_v42 = vpack.c.bf16 %v222_v38, %v219_v30 }
 0x298   :  { %v287_v36 = vsel %vm282_vm11, %v253_v34, 0 }
 0x299   :  { %296 = vmatpush.bf16.xpose.msrb.mxu1 %v287_v36 }
 0x29c   :  { %v278_v40 = vpop.f32.mrf.mxu3 }
 0x29d   :  { %v281_v41 = vpack.c.bf16 %v278_v40, %v275_v31  ;;  %v400_v14 = vpop.f32.mrf.mxu0 }
 0x29f   :  { %341 = vmatpush.bf16.msra.mxu2 %v281_v41 }
 0x2a0   :  { %2154 = vmatmul.msk.bf16.vlgmr.msrb.gmra.mxu1 %vm282_vm11, %v225_v42 }
 0x2a1   :  { %424 = vmatpush.msra.mxu1 %v2171_v35 }
 0x2a3   :  { %425 = vmatpush.msra.mxu1 %v2170_v37  ;;  %2352 = vmatpush.msrb.mxu2 %v2713_v59 }
 0x2a4   :  { %v371_v13 = vpop.f32.mrf.mxu3 }
 0x2a5   :  { %426 = vmatpush.msra.mxu1 %v2169_v39  ;;  %2353 = vmatpush.msrb.mxu2 %v2722_v61 }
 0x2a7   :  { %427 = vmatpush.msra.mxu1 %v2168_v43  ;;  %2354 = vmatpush.msrb.mxu2 %v2730_v0 }
 0x2a9   :  { %2355 = vmatpush.msrb.mxu2 %v2740_v3  ;;  %552 = vmatpush.msrb.mxu1 %v348_v10 }
 0x2ac   :  { %v374_v21 = vpop.f32.mrf.mxu3 }
 0x2ad   :  { %v377_v25 = vpack.c.bf16 %v374_v21, %v371_v13  ;;  %v2212_v13 = vld [vmem:[%s3515_s7 + $0x70] sm:$0xff] }
 0x2b0   :  { %2172 = vmatmul.msk.f32.vlgmr.msra.gmra.mxu1 %vm130_vm3, %v2751_v22 }
 0x2b8   :  { %2173 = vmatmul.msk.f32.gmra.mxu1 %vm130_vm3, %v2760_v28 }
 0x31d   :  { %v298_v44 = vpop.f32.mrf.mxu1 }
 0x31e   :  { %v303_v46 = vmul.f32 0.35355338, %v298_v44 }
 0x320   :  { %v305_v47 = vadd.f32 %v303_v46, %v2799_v45 }
 0x322   :  { %v308_v48 = vsel %vm307_vm12, %v305_v47, -inf }
 0x323   :  { %309 = vmax.xlane.f32.xlu0 %v308_v48  ;;  %v2190_v48 = vld [vmem:[%s3515_s7 + $0x58] sm:$0xff] }
 0x325   :  { %v300_v49 = vpop.f32.mrf.mxu1 }
 0x326   :  { %v304_v51 = vmul.f32 0.35355338, %v300_v49  ;;  %v2189_v49 = vld [vmem:[%s3515_s7 + $0x50] sm:$0xff] }
 0x328   :  { %v306_v52 = vadd.f32 %v304_v51, %v2806_v50  ;;  %v2188_v51 = vld [vmem:[%s3515_s7 + $0x48] sm:$0xff] }
 0x32a   :  { %v311_v53 = vsel %vm307_vm12, %v306_v52, -inf }
 0x32b   :  { %312 = vmax.xlane.f32.xlu1 %v311_v53 }
 0x32d   :  { %v429_v54 = vpop.f32.mrf.mxu1 }
 0x335   :  { %v432_v55 = vpop.f32.mrf.mxu1 }
 0x336   :  { %v435_v56 = vpack.c.bf16 %v432_v55, %v429_v54 }
 0x338   :  { %493 = vmatpush.bf16.msra.mxu3 %v435_v56 }
 0x33c   :  { %606 = vmatpush.msrb.mxu3 %v2190_v48 }
 0x33e   :  { %607 = vmatpush.msrb.mxu3 %v2189_v49 }
 0x340   :  { %608 = vmatpush.msrb.mxu3 %v2188_v51 }
 0x396   :  { %v310_v57 = vpop.xlane.xlu0 %309 }
 0x397   :  { %v314_v58 = vsub.f32 %v305_v47, %v310_v57 }
 0x399   :  { %v316_v59 = vmul.f32 1.442695, %v314_v58 }
 0x39b   :  { %2386 = vpow2.f32 %v316_v59 }
 0x39e   :  { %v313_v60 = vpop.xlane.xlu1 %312 }
 0x39f   :  { %v315_v61 = vsub.f32 %v306_v52, %v313_v60  ;;  %v2187_v52 = vld [vmem:[%s3515_s7 + $0x40] sm:$0xff]  ;;  %v2176_v60 = vld [vmem:[%s3517_s9 + $0x8] sm:$0xff] }
 0x3a0   :  { %609 = vmatpush.msrb.mxu3 %v2187_v52  ;;  %523 = vmatpush.msrb.mxu0 %v2176_v60 }
 0x3a1   :  { %v2387_v62 = vpop.eup %2386  ;;  %v318_v63 = vmul.f32 1.442695, %v315_v61  ;;  %v2196_v61 = vld [vmem:[%s3516_s8 + $0x58] sm:$0xff] }
 0x3a2   :  { %v320_v0 = vsel %vm307_vm12, %v2387_v62, 0.0  ;;  %635 = vmatpush.msra.mxu0 %v2196_v61 }
 0x3a3   :  { %2388 = vpow2.f32 %v318_v63  ;;  %321 = vadd.xlane.f32.xlu2 %v320_v0  ;;  %v2194_v63 = vld [vmem:[%s3516_s8 + $0x48] sm:$0xff]  ;;  %v2193_v0 = vld [vmem:[%s3516_s8 + $0x40] sm:$0xff] }
 0x3a9   :  { %v2389_v1 = vpop.eup %2388 }
 0x3aa   :  { %v323_v2 = vsel %vm307_vm12, %v2389_v1, 0.0 }
 0x3ab   :  { %324 = vadd.xlane.f32.xlu1 %v323_v2 }
 0x416   :  { %v322_v3 = vpop.xlane.xlu2 %321 }
 0x417   :  { %2390 = vrcp.f32 %v322_v3  ;;  %v2206_v3 = vld [vmem:[%s3514_s6 + $0x70] sm:$0xff] }
 0x41d   :  { %v2391_v5 = vpop.eup %2390 }
 0x41e   :  { %v325_v4 = vpop.xlane.xlu1 %324  ;;  %v328_v7 = vmul.f32 %v2391_v5, %v2387_v62  ;;  %v2195_v62 = vld [vmem:[%s3516_s8 + $0x50] sm:$0xff]  ;;  %v2204_v5 = vld [vmem:[%s3514_s6 + $0x60] sm:$0xff] }
 0x41f   :  { %2392 = vrcp.f32 %v325_v4  ;;  %636 = vmatpush.msra.mxu0 %v2195_v62  ;;  %v2205_v4 = vld [vmem:[%s3514_s6 + $0x68] sm:$0xff] }
 0x421   :  { %637 = vmatpush.msra.mxu0 %v2194_v63 }
 0x423   :  { %638 = vmatpush.msra.mxu0 %v2193_v0 }
 0x425   :  { %v2393_v6 = vpop.eup %2392 }
 0x426   :  { %v329_v8 = vmul.f32 %v2393_v6, %v2389_v1  ;;  %v2207_v1 = vld [vmem:[%s3514_s6 + $0x78] sm:$0xff] }
 0x428   :  { %v330_v9 = vpack.c.bf16 %v329_v8, %v328_v7 }
 0x42a   :  { %2155 = vmatmul.msk.bf16.vlgmr.msra.gmra.mxu2 %vm307_vm12, %v330_v9 }
 0x43a   :  { %2167 = vmatmul.msk.f32.vlgmr.msrb.gmra.mxu2 %vm130_vm3, %v2760_v28 }
 0x4ad   :  { %v343_v11 = vpop.f32.mrf.mxu2 }
 0x4ae   :  { %2179 = vmatmul.msk.f32.vlgmr.msrb.gmra.mxu1 %vm282_vm11, %v343_v11  ;;  %v2213_v11 = vld [vmem:[%s3515_s7 + $0x78] sm:$0xff] }
 0x4b5   :  { %v345_v12 = vpop.f32.mrf.mxu2 }
 0x4b6   :  { %2180 = vmatmul.msk.f32.gmra.mxu1 %vm282_vm11, %v345_v12 }
 0x4bd   :  { %v403_v15 = vpop.f32.mrf.mxu2 }
 0x4be   :  { %v406_v16 = vpack.c.bf16 %v403_v15, %v400_v14  ;;  %v2211_v15 = vld [vmem:[%s3515_s7 + $0x68] sm:$0xff] }
 0x4c0   :  { %v440_v18 = vsel %vm282_vm11, %v406_v16, 0 }
 0x4c1   :  { %449 = vmatpush.bf16.xpose.msra.mxu2 %v440_v18 }
 0x4c8   :  { %2174 = vmatmul.msk.bf16.vlgmr.msra.gmra.mxu2 %vm282_vm11, %v377_v25 }
 0x4c9   :  { %577 = vmatpush.msrb.mxu2 %v2184_v17  ;;  %v2210_v17 = vld [vmem:[%s3515_s7 + $0x60] sm:$0xff] }
 0x4cb   :  { %578 = vmatpush.msrb.mxu2 %v2183_v19 }
 0x4cd   :  { %579 = vmatpush.msrb.mxu2 %v2182_v23 }
 0x4cf   :  { %580 = vmatpush.msrb.mxu2 %v2181_v26 }
 0x4d8   :  { %2185 = vmatmul.msk.f32.vlgmr.msrb.gmra.mxu2 %vm130_vm3, %v2751_v22 }
 0x4e0   :  { %2186 = vmatmul.msk.f32.gmra.mxu2 %vm130_vm3, %v2760_v28 }
 0x52b   :  { %v2916_v18 = vpop.f32.mrf.mxu1 }
 0x533   :  { %v557_v21 = vpop.f32.mrf.mxu1 }
 0x54b   :  { %v451_v27 = vpop.f32.mrf.mxu2 }
 0x54c   :  { %v456_v29 = vmul.f32 0.35355338, %v451_v27 }
 0x54e   :  { %v458_v30 = vadd.f32 %v456_v29, %v2799_v45 }
 0x550   :  { %v460_v31 = vsel %vm307_vm12, %v458_v30, -inf }
 0x551   :  { %461 = vmax.xlane.f32.xlu2 %v460_v31 }
 0x553   :  { %v453_v33 = vpop.f32.mrf.mxu2 }
 0x554   :  { %v457_v34 = vmul.f32 0.35355338, %v453_v33 }
 0x556   :  { %v459_v35 = vadd.f32 %v457_v34, %v2806_v50 }
 0x558   :  { %v463_v36 = vsel %vm307_vm12, %v459_v35, -inf }
 0x559   :  { %464 = vmax.xlane.f32.xlu1 %v463_v36 }
 0x55b   :  { %v582_v8 = vpop.f32.mrf.mxu2 }
 0x563   :  { %v585_v14 = vpop.f32.mrf.mxu2 }
 0x564   :  { %v588_v16 = vpack.c.bf16 %v585_v14, %v582_v8 }
 0x5c4   :  { %v462_v37 = vpop.xlane.xlu2 %461 }
 0x5c5   :  { %v466_v38 = vsub.f32 %v458_v30, %v462_v37  ;;  %v2201_v30 = vld [vmem:[%s3517_s9 + $0x10] sm:$0xff] }
 0x5c7   :  { %v468_v39 = vmul.f32 1.442695, %v466_v38 }
 0x5c9   :  { %2394 = vpow2.f32 %v468_v39 }
 0x5cc   :  { %v465_v40 = vpop.xlane.xlu1 %464 }
 0x5cd   :  { %v467_v41 = vsub.f32 %v459_v35, %v465_v40 }
 0x5cf   :  { %v2395_v42 = vpop.eup %2394  ;;  %v470_v43 = vmul.f32 1.442695, %v467_v41 }
 0x5d0   :  { %v472_v44 = vsel %vm307_vm12, %v2395_v42, 0.0 }
 0x5d1   :  { %2396 = vpow2.f32 %v470_v43  ;;  %473 = vadd.xlane.f32.xlu2 %v472_v44 }
 0x5d7   :  { %v2397_v46 = vpop.eup %2396 }
 0x5d8   :  { %v475_v47 = vsel %vm307_vm12, %v2397_v46, 0.0 }
 0x5d9   :  { %476 = vadd.xlane.f32.xlu1 %v475_v47 }
 0x644   :  { %v474_v53 = vpop.xlane.xlu2 %473 }
 0x645   :  { %2398 = vrcp.f32 %v474_v53 }
 0x64b   :  { %v2399_v55 = vpop.eup %2398 }
 0x64c   :  { %v477_v54 = vpop.xlane.xlu1 %476  ;;  %v480_v57 = vmul.f32 %v2399_v55, %v2395_v42 }
 0x64d   :  { %2400 = vrcp.f32 %v477_v54 }
 0x653   :  { %v2401_v56 = vpop.eup %2400 }
 0x654   :  { %v481_v58 = vmul.f32 %v2401_v56, %v2397_v46  ;;  %v2219_v56 = vld [vmem:[%s3516_s8 + $0x78] sm:$0xff] }
 0x656   :  { %v482_v59 = vpack.c.bf16 %v481_v58, %v480_v57  ;;  %v2218_v57 = vld [vmem:[%s3516_s8 + $0x70] sm:$0xff]  ;;  %v2217_v58 = vld [vmem:[%s3516_s8 + $0x68] sm:$0xff] }
 0x658   :  { %2175 = vmatmul.msk.bf16.vlgmr.msra.gmra.mxu3 %vm307_vm12, %v482_v59  ;;  %v2216_v59 = vld [vmem:[%s3516_s8 + $0x60] sm:$0xff] }
 0x659   :  { %734 = vmatpush.msra.mxu3 %v2201_v30 }
 0x668   :  { %2191 = vmatmul.msk.f32.vlgmr.msrb.gmra.mxu3 %vm130_vm3, %v2751_v22 }
 0x670   :  { %2192 = vmatmul.msk.f32.gmra.mxu3 %vm130_vm3, %v2760_v28 }
 0x6db   :  { %v495_v2 = vpop.f32.mrf.mxu3 }
 0x6dc   :  { %2177 = vmatmul.msk.f32.vlgmr.msrb.gmra.mxu0 %vm282_vm11, %v495_v2 }
 0x6dd   :  { %761 = vmatpush.msrb.mxu0 %v2207_v1 }
 0x6df   :  { %762 = vmatpush.msrb.mxu0 %v2206_v3 }
 0x6e1   :  { %763 = vmatpush.msrb.mxu0 %v2205_v4 }
 0x6e3   :  { %v497_v6 = vpop.f32.mrf.mxu3  ;;  %764 = vmatpush.msrb.mxu0 %v2204_v5 }
 0x6e4   :  { %2178 = vmatmul.msk.f32.gmra.mxu0 %vm282_vm11, %v497_v6 }
 0x6eb   :  { %v611_v7 = vpop.f32.mrf.mxu3 }
 0x6ec   :  { %2197 = vmatmul.msk.f32.vlgmr.msra.gmra.mxu0 %vm130_vm3, %v2751_v22 }
 0x6f3   :  { %v614_v9 = vpop.f32.mrf.mxu3 }
 0x6f4   :  { %v617_v10 = vpack.c.bf16 %v614_v9, %v611_v7  ;;  %2198 = vmatmul.msk.f32.gmra.mxu0 %vm130_vm3, %v2760_v28 }
 0x6f6   :  { %v651_v12 = vsel %vm282_vm11, %v617_v10, 0 }
 0x6f7   :  { %660 = vmatpush.bf16.xpose.msra.mxu1 %v651_v12 }
 0x6fc   :  { %2208 = vmatmul.msk.f32.vlgmr.msrb.gmra.mxu0 %vm130_vm3, %v2751_v22 }
 0x6fe   :  { %2199 = vmatmul.msk.bf16.vlgmr.msra.gmra.mxu1 %vm282_vm11, %v588_v16 }
 0x6ff   :  { %790 = vmatpush.msrb.mxu1 %v2213_v11 }
 0x701   :  { %791 = vmatpush.msrb.mxu1 %v2212_v13 }
 0x703   :  { %792 = vmatpush.msrb.mxu1 %v2211_v15 }
 0x704   :  { %2209 = vmatmul.msk.f32.gmra.mxu0 %vm130_vm3, %v2760_v28 }
 0x705   :  { %793 = vmatpush.msrb.mxu1 %v2210_v17 }
 0x70e   :  { %2214 = vmatmul.msk.f32.vlgmr.msrb.gmra.mxu1 %vm130_vm3, %v2751_v22 }
 0x716   :  { %2215 = vmatmul.msk.f32.gmra.mxu1 %vm130_vm3, %v2760_v28 }
 0x759   :  { %v2918_v19 = vpop.f32.mrf.mxu0 }
 0x761   :  { %v528_v23 = vpop.f32.mrf.mxu0 }
 0x762   :  { %v2920_v25 = vadd.f32 %v557_v21, %v528_v23 }
 0x769   :  { %v640_v26 = vpop.f32.mrf.mxu0 }
 0x771   :  { %v643_v27 = vpop.f32.mrf.mxu0 }
 0x772   :  { %v646_v29 = vpack.c.bf16 %v643_v27, %v640_v26 }
 0x774   :  { %704 = vmatpush.bf16.msra.mxu2 %v646_v29 }
 0x778   :  { %819 = vmatpush.msrb.mxu2 %v2219_v56 }
 0x779   :  { %v766_v4 = vpop.f32.mrf.mxu0 }
 0x77a   :  { %820 = vmatpush.msrb.mxu2 %v2218_v57 }
 0x77b   :  { %v662_v31 = vpop.f32.mrf.mxu1 }
 0x77c   :  { %v667_v33 = vmul.f32 0.35355338, %v662_v31  ;;  %821 = vmatpush.msrb.mxu2 %v2217_v58 }
 0x77e   :  { %v669_v34 = vadd.f32 %v667_v33, %v2799_v45  ;;  %822 = vmatpush.msrb.mxu2 %v2216_v59 }
 0x780   :  { %v671_v35 = vsel %vm307_vm12, %v669_v34, -inf }
 0x781   :  { %672 = vmax.xlane.f32.xlu2 %v671_v35  ;;  %v769_v6 = vpop.f32.mrf.mxu0 }
 0x782   :  { %v772_v7 = vpack.c.bf16 %v769_v6, %v766_v4  ;;  %v993_v4 = vld [vmem:[%s3521_s13 + $0x8] sm:$0xff] }
 0x783   :  { %v664_v36 = vpop.f32.mrf.mxu1 }
 0x784   :  { %v668_v37 = vmul.f32 0.35355338, %v664_v36 }
 0x786   :  { %v670_v38 = vadd.f32 %v668_v37, %v2806_v50 }
 0x788   :  { %v674_v39 = vsel %vm307_vm12, %v670_v38, -inf }
 0x789   :  { %675 = vmax.xlane.f32.xlu1 %v674_v39 }
 0x78b   :  { %v795_v40 = vpop.f32.mrf.mxu1 }
 0x793   :  { %v798_v41 = vpop.f32.mrf.mxu1 }
 0x794   :  { %v801_v42 = vpack.c.bf16 %v798_v41, %v795_v40 }
 0x796   :  { %v835_v43 = vsel %vm282_vm11, %v801_v42, 0 }
 0x797   :  { %844 = vmatpush.bf16.xpose.msrb.mxu3 %v835_v43 }
 0x7f4   :  { %v673_v44 = vpop.xlane.xlu2 %672 }
 0x7f5   :  { %v677_v46 = vsub.f32 %v669_v34, %v673_v44 }
 0x7f7   :  { %v679_v47 = vmul.f32 1.442695, %v677_v46 }
 0x7f9   :  { %2402 = vpow2.f32 %v679_v47 }
 0x7fc   :  { %v676_v48 = vpop.xlane.xlu1 %675 }
 0x7fd   :  { %v678_v49 = vsub.f32 %v670_v38, %v676_v48  ;;  %v2365_v48 = vld [vmem:[%s3518_s10] ss:$0 sm:$0xff] }
 0x7ff   :  { %v2403_v51 = vpop.eup %2402  ;;  %v681_v52 = vmul.f32 1.442695, %v678_v49 }
 0x800   :  { %v683_v53 = vsel %vm307_vm12, %v2403_v51, 0.0 }
 0x801   :  { %2404 = vpow2.f32 %v681_v52  ;;  %684 = vadd.xlane.f32.xlu2 %v683_v53 }
 0x807   :  { %v2405_v54 = vpop.eup %2404 }
 0x808   :  { %v686_v55 = vsel %vm307_vm12, %v2405_v54, 0.0 }
 0x809   :  { %687 = vadd.xlane.f32.xlu1 %v686_v55 }
 0x874   :  { %v685_v60 = vpop.xlane.xlu2 %684 }
 0x875   :  { %2406 = vrcp.f32 %v685_v60 }
 0x87b   :  { %v2407_v62 = vpop.eup %2406 }
 0x87c   :  { %v688_v61 = vpop.xlane.xlu1 %687  ;;  %v691_v0 = vmul.f32 %v2407_v62, %v2403_v51 }
 0x87d   :  { %2408 = vrcp.f32 %v688_v61 }
 0x883   :  { %v2409_v63 = vpop.eup %2408 }
 0x884   :  { %v692_v1 = vmul.f32 %v2409_v63, %v2405_v54 }
 0x886   :  { %v693_v2 = vpack.c.bf16 %v692_v1, %v691_v0 }
 0x888   :  { %2200 = vmatmul.msk.bf16.vlgmr.msra.gmra.mxu2 %vm307_vm12, %v693_v2  ;;  %v995_v2 = vld [vmem:[%s3521_s13 + $0x18] sm:$0xff] }
 0x889   :  { %1018 = vmatpush.msra.mxu2 %v995_v2 }
 0x898   :  { %2220 = vmatmul.msk.f32.vlgmr.msrb.gmra.mxu2 %vm130_vm3, %v2751_v22  ;;  %v555_v22 = vadd.f32 %v2916_v18, %v2918_v19 }
 0x8a0   :  { %2221 = vmatmul.msk.f32.gmra.mxu2 %vm130_vm3, %v2760_v28 }
 0x90b   :  { %v706_v3 = vpop.f32.mrf.mxu2 }
 0x90c   :  { %2202 = vmatmul.msk.f32.vlgmr.msra.gmra.mxu3 %vm282_vm11, %v706_v3  ;;  %v994_v3 = vld [vmem:[%s3521_s13 + $0x10] sm:$0xff] }
 0x90d   :  { %1019 = vmatpush.msra.mxu2 %v994_v3 }
 0x90f   :  { %1020 = vmatpush.msra.mxu2 %v993_v4 }
 0x913   :  { %v708_v5 = vpop.f32.mrf.mxu2 }
 0x914   :  { %2203 = vmatmul.msk.f32.gmra.mxu3 %vm282_vm11, %v708_v5  ;;  %v992_v5 = vld [vmem:[%s3521_s13] sm:$0xff] }
 0x915   :  { %1021 = vmatpush.msra.mxu2 %v992_v5 }
 0x91b   :  { %v824_v8 = vpop.f32.mrf.mxu2 }
 0x91c   :  { %2222 = vmatmul.msk.bf16.vlgmr.msrb.gmra.mxu3 %vm282_vm11, %v772_v7 }
 0x923   :  { %v827_v9 = vpop.f32.mrf.mxu2 }
 0x924   :  { %v830_v10 = vpack.c.bf16 %v827_v9, %v824_v8  ;;  %v1046_v9 = vld [vmem:[%s3523_s15 + $0x78] sm:$0xff] }
 0x925   :  { %1051 = vmatpush.msra.mxu3 %v1046_v9 }
 0x926   :  { %888 = vmatpush.bf16.msra.mxu0 %v830_v10  ;;  %v1045_v10 = vld [vmem:[%s3523_s15 + $0x70] sm:$0xff] }
 0x927   :  { %1052 = vmatpush.msra.mxu3 %v1045_v10 }
 0x98f   :  { %v736_v11 = vpop.f32.mrf.mxu3 }
 0x990   :  { %v742_v28 = vadd.f32 %v736_v11, %v555_v22  ;;  %v1044_v22 = vld [vmem:[%s3523_s15 + $0x68] sm:$0xff] }
 0x991   :  { %1053 = vmatpush.msra.mxu3 %v1044_v22 }
 0x997   :  { %v739_v12 = vpop.f32.mrf.mxu3 }
 0x998   :  { %v743_v13 = vadd.f32 %v739_v12, %v2920_v25  ;;  %v1043_v12 = vld [vmem:[%s3523_s15 + $0x60] sm:$0xff] }
 0x999   :  { %1054 = vmatpush.msra.mxu3 %v1043_v12 }
 0x99f   :  { %v846_v14 = vpop.f32.mrf.mxu3 }
 0x9a0   :  { %v851_v15 = vmul.f32 0.35355338, %v846_v14 }
 0x9a2   :  { %v853_v16 = vadd.f32 %v851_v15, %v2799_v45  ;;  %v1042_v15 = vld [vmem:[%s3523_s15 + $0x58] sm:$0xff] }
 0x9a3   :  { %1055 = vmatpush.msra.mxu3 %v1042_v15  ;;  %v2246_v15 = vld [vmem:[%s3516_s8 + $0x98] sm:$0xff] }
 0x9a4   :  { %v855_v17 = vsel %vm307_vm12, %v853_v16, -inf  ;;  %1217 = vmatpush.msrb.mxu2 %v2246_v15 }
 0x9a5   :  { %856 = vmax.xlane.f32.xlu2 %v855_v17  ;;  %v1041_v17 = vld [vmem:[%s3523_s15 + $0x50] sm:$0xff] }
 0x9a6   :  { %1056 = vmatpush.msra.mxu3 %v1041_v17  ;;  %v2233_v17 = vld [vmem:[%s3514_s6 + $0x90] sm:$0xff] }
 0x9a7   :  { %v848_v21 = vpop.f32.mrf.mxu3 }
 0x9a8   :  { %v852_v23 = vmul.f32 0.35355338, %v848_v21 }
 0x9aa   :  { %v854_v26 = vadd.f32 %v852_v23, %v2806_v50  ;;  %v2224_v50 = vld [vmem:[%s3517_s9 + $0x18] sm:$0xff]  ;;  %v1040_v23 = vld [vmem:[%s3523_s15 + $0x48] sm:$0xff] }
 0x9ab   :  { %918 = vmatpush.msra.mxu1 %v2224_v50  ;;  %1057 = vmatpush.msra.mxu3 %v1040_v23  ;;  %v2367_v50 = vld [vmem:[%s3520_s12] ss:$0 sm:$0xff]  ;;  %v2245_v23 = vld [vmem:[%s3516_s8 + $0x90] sm:$0xff] }
 0x9ac   :  { %v858_v27 = vsel %vm307_vm12, %v854_v26, -inf  ;;  %1218 = vmatpush.msrb.mxu2 %v2245_v23 }
 0x9ad   :  { %859 = vmax.xlane.f32.xlu0 %v858_v27  ;;  %v1039_v27 = vld [vmem:[%s3523_s15 + $0x40] sm:$0xff] }
 0x9ae   :  { %1058 = vmatpush.msra.mxu3 %v1039_v27  ;;  %v2232_v27 = vld [vmem:[%s3514_s6 + $0x88] sm:$0xff] }
 0xa18   :  { %v857_v18 = vpop.xlane.xlu2 %856 }
 0xa19   :  { %v861_v19 = vsub.f32 %v853_v16, %v857_v18 }
 0xa1b   :  { %v863_v29 = vmul.f32 1.442695, %v861_v19 }
 0xa1d   :  { %2410 = vpow2.f32 %v863_v29  ;;  %v1038_v29 = vld [vmem:[%s3523_s15 + $0x38] sm:$0xff] }
 0xa1e   :  { %1059 = vmatpush.msra.mxu3 %v1038_v29  ;;  %v2259_v29 = vld [vmem:[%s3515_s7 + $0xa8] sm:$0xff] }
 0xa20   :  { %v860_v30 = vpop.xlane.xlu0 %859 }
 0xa21   :  { %v862_v25 = vsub.f32 %v854_v26, %v860_v30 }
 0xa23   :  { %v2411_v31 = vpop.eup %2410  ;;  %v865_v33 = vmul.f32 1.442695, %v862_v25 }
 0xa24   :  { %v867_v45 = vsel %vm307_vm12, %v2411_v31, 0.0 }
 0xa25   :  { %2412 = vpow2.f32 %v865_v33  ;;  %868 = vadd.xlane.f32.xlu1 %v867_v45  ;;  %v1037_v33 = vld [vmem:[%s3523_s15 + $0x30] sm:$0xff] }
 0xa26   :  { %1060 = vmatpush.msra.mxu3 %v1037_v33  ;;  %v2258_v33 = vld [vmem:[%s3515_s7 + $0xa0] sm:$0xff] }
 0xa2b   :  { %v2413_v34 = vpop.eup %2412 }
 0xa2c   :  { %v870_v35 = vsel %vm307_vm12, %v2413_v34, 0.0 }
 0xa2d   :  { %871 = vadd.xlane.f32.xlu2 %v870_v35 }
 0xa98   :  { %v869_v36 = vpop.xlane.xlu1 %868 }
 0xa99   :  { %2414 = vrcp.f32 %v869_v36  ;;  %v1036_v36 = vld [vmem:[%s3523_s15 + $0x28] sm:$0xff] }
 0xa9a   :  { %1061 = vmatpush.msra.mxu3 %v1036_v36  ;;  %v2254_v36 = vld [vmem:[%s3514_s6 + $0xb0] sm:$0xff] }
 0xa9f   :  { %v2415_v38 = vpop.eup %2414 }
 0xaa0   :  { %v872_v37 = vpop.xlane.xlu2 %871  ;;  %v875_v40 = vmul.f32 %v2415_v38, %v2411_v31  ;;  %v2366_v31 = vld [vmem:[%s3519_s11] ss:$0 sm:$0xff] }
 0xaa1   :  { %2416 = vrcp.f32 %v872_v37 }
 0xaa7   :  { %v2417_v39 = vpop.eup %2416 }
 0xaa8   :  { %v876_v41 = vmul.f32 %v2417_v39, %v2413_v34  ;;  %v1035_v39 = vld [vmem:[%s3523_s15 + $0x20] sm:$0xff] }
 0xaa9   :  { %1062 = vmatpush.msra.mxu3 %v1035_v39 }
 0xaaa   :  { %v877_v42 = vpack.c.bf16 %v876_v41, %v875_v40 }
 0xaac   :  { %2223 = vmatmul.msk.bf16.vlgmr.msra.gmra.mxu0 %vm307_vm12, %v877_v42  ;;  %v1034_v42 = vld [vmem:[%s3523_s15 + $0x18] sm:$0xff] }
 0xaad   :  { %1063 = vmatpush.msra.mxu3 %v1034_v42 }
 0xb29   :  { %v890_v43 = vpop.f32.mrf.mxu0 }
 0xb2a   :  { %2225 = vmatmul.msk.f32.vlgmr.msra.gmra.mxu1 %vm282_vm11, %v890_v43 }
 0xb31   :  { %v892_v44 = vpop.f32.mrf.mxu0 }
 0xb32   :  { %2226 = vmatmul.msk.f32.gmra.mxu1 %vm282_vm11, %v892_v44 }
 0xba7   :  { %v920_v46 = vpop.f32.mrf.mxu1 }
 0xba8   :  { %v926_v47 = vadd.f32 %v920_v46, %v742_v28 }
 0xbaa   :  { %v928_v49 = vadd.f32 %v926_v47, %v2643_v20 }
 0xbac   :  { %v2971_v51 = vadd.f32 %v2365_v48, %v928_v49  ;;  %v1033_v49 = vld [vmem:[%s3523_s15 + $0x10] sm:$0xff] }
 0xbad   :  { %1064 = vmatpush.msra.mxu3 %v1033_v49 }
 0xbae   :  { %v938_v52 = vsel %vm130_vm3, %v2971_v51, 0.0 }
 0xbaf   :  { %939 = vadd.xlane.f32.xlu0 %v938_v52  ;;  %v923_v53 = vpop.f32.mrf.mxu1  ;;  %v1032_v52 = vld [vmem:[%s3523_s15 + $0x8] sm:$0xff] }
 0xbb0   :  { %v927_v54 = vadd.f32 %v923_v53, %v743_v13  ;;  %1065 = vmatpush.msra.mxu3 %v1032_v52  ;;  %v1031_v53 = vld [vmem:[%s3523_s15] sm:$0xff] }
 0xbb2   :  { %v929_v55 = vadd.f32 %v927_v54, %v2650_v24  ;;  %1066 = vmatpush.msra.mxu3 %v1031_v53  ;;  %v2368_v54 = vld [vmem:[%s3522_s14] ss:$0 sm:$0xff]  ;;  %v2370_v53 = vld [vmem:[%s3547_s29 + $0x1] ss:$0 sm:$0xff] }
 0xbb4   :  { %v2976_v56 = vadd.f32 %v2365_v48, %v929_v55 }
 0xbb6   :  { %v941_v57 = vsel %vm130_vm3, %v2976_v56, 0.0 }
 0xbb7   :  { %942 = vadd.xlane.f32.xlu1 %v941_v57 }
 0xc22   :  { %v940_v58 = vpop.xlane.xlu0 %939 }
 0xc23   :  { %v944_v59 = vmul.f32 %v940_v58, %v2654_v32 }
 0xc25   :  { %v946_v20 = vsub.f32 %v2971_v51, %v944_v59 }
 0xc27   :  { %v948_v60 = vmul.f32 %v946_v20, %v946_v20 }
 0xc29   :  { %v950_v61 = vsel %vm130_vm3, %v948_v60, 0.0 }
 0xc2a   :  { %951 = vadd.xlane.f32.xlu2 %v950_v61  ;;  %v943_v62 = vpop.xlane.xlu1 %942  ;;  %v2369_v61 = vld [vmem:[%s3550_s30] ss:$0 sm:$0xff] }
 0xc2b   :  { %v945_v63 = vmul.f32 %v943_v62, %v2654_v32 }
 0xc2d   :  { %v2985_v24 = vsub.f32 %v2976_v56, %v945_v63 }
 0xc2f   :  { %v949_v0 = vmul.f32 %v2985_v24, %v2985_v24 }
 0xc31   :  { %v953_v1 = vsel %vm130_vm3, %v949_v0, 0.0 }
 0xc32   :  { %954 = vadd.xlane.f32.xlu0 %v953_v1 }
 0xc9d   :  { %v952_v6 = vpop.xlane.xlu2 %951 }
 0xc9e   :  { %v956_v7 = vmul.f32 %v952_v6, %v2654_v32 }
 0xca0   :  { %v958_v8 = vadd.f32 1e-05, %v956_v7 }
 0xca2   :  { %2418 = vrsqrt.f32 %v958_v8  ;;  %vm966_vm14 = vweird.f32 %v958_v8 }
 0xca5   :  { %v955_v11 = vpop.xlane.xlu0 %954 }
 0xca6   :  { %v957_v28 = vmul.f32 %v955_v11, %v2654_v32 }
 0xca8   :  { %v2419_v13 = vpop.eup %2418  ;;  %v959_v14 = vadd.f32 1e-05, %v957_v28 }
 0xca9   :  { %v961_v16 = vmul.f32 %v2419_v13, %v958_v8  ;;  %vm967_vm13 = vweird.f32 %v2419_v13 }
 0xcaa   :  { %2420 = vrsqrt.f32 %v959_v14  ;;  %vm968_vm15 = vmor %vm966_vm14, %vm967_vm13  ;;  %vm976_vm1 = vweird.f32 %v959_v14 }
 0xcab   :  { %v962_v21 = vmul.f32 %v2419_v13, %v961_v16  ;;  %v2261_v16 = vld [vmem:[%s3515_s7 + $0xb8] sm:$0xff] }
 0xcac   :  { %1341 = vmatpush.msrb.mxu3 %v2261_v16  ;;  %v2264_v16 = vld [vmem:[%s3516_s8 + $0xa0] sm:$0xff] }
 0xcad   :  { %v963_v26 = vmul.f32 0.5, %v962_v21  ;;  %v2239_v21 = vld [vmem:[%s3515_s7 + $0x90] sm:$0xff] }
 0xcaf   :  { %v964_v18 = vsub.f32 1.5, %v963_v26  ;;  %v2260_v26 = vld [vmem:[%s3515_s7 + $0xb0] sm:$0xff] }
 0xcb0   :  { %v2421_v19 = vpop.eup %2420  ;;  %1342 = vmatpush.msrb.mxu3 %v2260_v26  ;;  %v3207_v26 = vld [vmem:[%s3549_s3] sm:$0xff] }
 0xcb1   :  { %v965_v30 = vmul.f32 %v2419_v13, %v964_v18  ;;  %v971_v25 = vmul.f32 %v2421_v19, %v959_v14  ;;  %vm977_vm0 = vweird.f32 %v2421_v19  ;;  %v2240_v14 = vld [vmem:[%s3515_s7 + $0x98] sm:$0xff]  ;;  %v2238_v18 = vld [vmem:[%s3515_s7 + $0x88] sm:$0xff] }
 0xcb2   :  { %vm978_vm2 = vmor %vm976_vm1, %vm977_vm0  ;;  %1188 = vmatpush.msrb.mxu1 %v2240_v14  ;;  %1343 = vmatpush.msrb.mxu3 %v2259_v29 }
 0xcb3   :  { %v969_v45 = vsel %vm968_vm15, %v2419_v13, %v965_v30  ;;  %v972_v34 = vmul.f32 %v2421_v19, %v971_v25  ;;  %v2234_v13 = vld [vmem:[%s3514_s6 + $0x98] sm:$0xff]  ;;  %v2231_v30 = vld [vmem:[%s3514_s6 + $0x80] sm:$0xff] }
 0xcb4   :  { %v980_v35 = vmul.f32 %v969_v45, %v946_v20  ;;  %1159 = vmatpush.msrb.mxu0 %v2234_v13  ;;  %1189 = vmatpush.msrb.mxu1 %v2239_v21  ;;  %v2237_v25 = vld [vmem:[%s3515_s7 + $0x80] sm:$0xff] }
 0xcb5   :  { %v973_v37 = vmul.f32 0.5, %v972_v34  ;;  %1344 = vmatpush.msrb.mxu3 %v2258_v33 }
 0xcb6   :  { %v985_v38 = vmul.f32 %v2366_v31, %v980_v35  ;;  %1160 = vmatpush.msrb.mxu0 %v2233_v17  ;;  %1190 = vmatpush.msrb.mxu1 %v2238_v18 }
 0xcb7   :  { %v974_v40 = vsub.f32 1.5, %v973_v37 }
 0xcb8   :  { %v990_v41 = vadd.f32 %v2367_v50, %v985_v38  ;;  %1161 = vmatpush.msrb.mxu0 %v2232_v27  ;;  %1191 = vmatpush.msrb.mxu1 %v2237_v25  ;;  %v2253_v38 = vld [vmem:[%s3514_s6 + $0xa8] sm:$0xff] }
 0xcb9   :  { %v975_v43 = vmul.f32 %v2421_v19, %v974_v40  ;;  %v2252_v40 = vld [vmem:[%s3514_s6 + $0xa0] sm:$0xff] }
 0xcba   :  { %2227 = vmatmul.msk.f32.vlgmr.msra.gmra.mxu2 %vm130_vm3, %v990_v41  ;;  %1162 = vmatpush.msrb.mxu0 %v2231_v30  ;;  %v3214_v30 = vld [vmem:[%s3549_s3 + $0x8] sm:$0xff] }
 0xcbb   :  { %v979_v44 = vsel %vm978_vm2, %v2421_v19, %v975_v43  ;;  %v2244_v19 = vld [vmem:[%s3516_s8 + $0x88] sm:$0xff] }
 0xcbc   :  { %v981_v46 = vmul.f32 %v979_v44, %v2985_v24  ;;  %1219 = vmatpush.msrb.mxu2 %v2244_v19 }
 0xcbe   :  { %v986_v47 = vmul.f32 %v2366_v31, %v981_v46  ;;  %v2243_v31 = vld [vmem:[%s3516_s8 + $0x80] sm:$0xff] }
 0xcbf   :  { %1220 = vmatpush.msrb.mxu2 %v2243_v31 }
 0xcc0   :  { %v991_v48 = vadd.f32 %v2367_v50, %v986_v47  ;;  %v2255_v50 = vld [vmem:[%s3514_s6 + $0xb8] sm:$0xff] }
 0xcc1   :  { %1312 = vmatpush.msra.mxu2 %v2255_v50 }
 0xcc2   :  { %2228 = vmatmul.msk.f32.gmra.mxu2 %vm130_vm3, %v991_v48 }
 0xcc3   :  { %1313 = vmatpush.msra.mxu2 %v2254_v36 }
 0xcc5   :  { %1314 = vmatpush.msra.mxu2 %v2253_v38 }
 0xcc7   :  { %1315 = vmatpush.msra.mxu2 %v2252_v40 }
 0xd3d   :  { %v1023_v55 = vpop.f32.mrf.mxu2 }
 0xd3e   :  { %v1024_v57 = vadd.f32 %v2368_v54, %v1023_v55 }
 0xd40   :  { %v1029_v58 = vmax.f32 %v1024_v57, 0.0  ;;  %v2371_v57 = vld [vmem:[%s3548_s4 + $0x1] ss:$0 sm:$0xff] }
 0xd42   :  { %1067 = vmatmul.f32.vlgmr.msra.gmra.mxu3 %v1029_v58 }
 0xd45   :  { %v1026_v59 = vpop.f32.mrf.mxu2 }
 0xd46   :  { %v1027_v20 = vadd.f32 %v2368_v54, %v1026_v59 }
 0xd48   :  { %v1030_v60 = vmax.f32 %v1027_v20, 0.0 }
 0xd4a   :  { %1070 = vmatmul.f32.gmra.mxu3 %v1030_v60 }
 0xdc5   :  { %v1068_v62 = vpop.f32.mrf.mxu3 }
 0xdc6   :  { %v1069_v63 = vadd.f32 %v2369_v61, %v1068_v62 }
 0xdc8   :  { %v1074_v24 = vmax.f32 %v1069_v63, 0.0 }
 0xdca   :  { %v3068_v0 = vadd.f32 %v1074_v24, %v2971_v51 }
 0xdcc   :  { %v1082_v1 = vsel %vm130_vm3, %v3068_v0, 0.0 }
 0xdcd   :  { %1083 = vadd.xlane.f32.xlu1 %v1082_v1  ;;  %v1071_v2 = vpop.f32.mrf.mxu3 }
 0xdce   :  { %v1072_v3 = vadd.f32 %v2369_v61, %v1071_v2 }
 0xdd0   :  { %v1075_v4 = vmax.f32 %v1072_v3, 0.0 }
 0xdd2   :  { %v3073_v5 = vadd.f32 %v1075_v4, %v2976_v56 }
 0xdd4   :  { %v1085_v6 = vsel %vm130_vm3, %v3073_v5, 0.0 }
 0xdd5   :  { %1086 = vadd.xlane.f32.xlu2 %v1085_v6 }
 0xe40   :  { %v1084_v7 = vpop.xlane.xlu1 %1083 }
 0xe41   :  { %v1088_v8 = vmul.f32 %v1084_v7, %v2654_v32 }
 0xe43   :  { %v3079_v51 = vsub.f32 %v3068_v0, %v1088_v8 }
 0xe45   :  { %v1092_v9 = vmul.f32 %v3079_v51, %v3079_v51 }
 0xe47   :  { %v1094_v10 = vsel %vm130_vm3, %v1092_v9, 0.0  ;;  %v2267_v9 = vld [vmem:[%s3516_s8 + $0xb8] sm:$0xff] }
 0xe48   :  { %v1087_v22 = vpop.xlane.xlu2 %1086  ;;  %1095 = vadd.xlane.f32.xlu0 %v1094_v10 }
 0xe49   :  { %v1089_v56 = vmul.f32 %v1087_v22, %v2654_v32  ;;  %v2266_v22 = vld [vmem:[%s3516_s8 + $0xb0] sm:$0xff] }
 0xe4b   :  { %v3086_v11 = vsub.f32 %v3073_v5, %v1089_v56 }
 0xe4d   :  { %v1093_v28 = vmul.f32 %v3086_v11, %v3086_v11 }
 0xe4f   :  { %v1097_v12 = vsel %vm130_vm3, %v1093_v28, 0.0 }
 0xe50   :  { %1098 = vadd.xlane.f32.xlu1 %v1097_v12 }
 0xebb   :  { %v1096_v45 = vpop.xlane.xlu0 %1095 }
 0xebc   :  { %v1100_v34 = vmul.f32 %v1096_v45, %v2654_v32 }
 0xebe   :  { %v1102_v35 = vadd.f32 1e-05, %v1100_v34 }
 0xec0   :  { %2422 = vrsqrt.f32 %v1102_v35  ;;  %vm1110_vm5 = vweird.f32 %v1102_v35 }
 0xec3   :  { %v1099_v37 = vpop.xlane.xlu1 %1098 }
 0xec4   :  { %v1101_v39 = vmul.f32 %v1099_v37, %v2654_v32 }
 0xec6   :  { %v2423_v41 = vpop.eup %2422  ;;  %v1103_v42 = vadd.f32 1e-05, %v1101_v39 }
 0xec7   :  { %v1105_v43 = vmul.f32 %v2423_v41, %v1102_v35  ;;  %vm1111_vm4 = vweird.f32 %v2423_v41 }
 0xec8   :  { %2424 = vrsqrt.f32 %v1103_v42  ;;  %vm1112_vm6 = vmor %vm1110_vm5, %vm1111_vm4  ;;  %vm1120_vm8 = vweird.f32 %v1103_v42 }
 0xec9   :  { %v1106_v44 = vmul.f32 %v2423_v41, %v1105_v43 }
 0xecb   :  { %v1107_v46 = vmul.f32 0.5, %v1106_v44 }
 0xecd   :  { %v1108_v47 = vsub.f32 1.5, %v1107_v46 }
 0xece   :  { %v2425_v48 = vpop.eup %2424 }
 0xecf   :  { %v1109_v49 = vmul.f32 %v2423_v41, %v1108_v47  ;;  %v1115_v52 = vmul.f32 %v2425_v48, %v1103_v42  ;;  %vm1121_vm7 = vweird.f32 %v2425_v48 }
 0xed0   :  { %vm1122_vm9 = vmor %vm1120_vm8, %vm1121_vm7 }
 0xed1   :  { %v1113_v54 = vsel %vm1112_vm6, %v2423_v41, %v1109_v49  ;;  %v1116_v55 = vmul.f32 %v2425_v48, %v1115_v52 }
 0xed2   :  { %v1124_v58 = vmul.f32 %v1113_v54, %v3079_v51  ;;  %v2280_v54 = vld [vmem:[%s3514_s6 + $0xd8] sm:$0xff] }
 0xed3   :  { %v1117_v59 = vmul.f32 0.5, %v1116_v55  ;;  %v2279_v55 = vld [vmem:[%s3514_s6 + $0xd0] sm:$0xff] }
 0xed4   :  { %v1129_v20 = vmul.f32 %v2370_v53, %v1124_v58  ;;  %v2278_v58 = vld [vmem:[%s3514_s6 + $0xc8] sm:$0xff] }
 0xed5   :  { %v1118_v60 = vsub.f32 1.5, %v1117_v59  ;;  %v2277_v59 = vld [vmem:[%s3514_s6 + $0xc0] sm:$0xff] }
 0xed6   :  { %v3160_v61 = vadd.f32 %v2371_v57, %v1129_v20 }
 0xed7   :  { %v1119_v62 = vmul.f32 %v2425_v48, %v1118_v60 }
 0xed8   :  { %2235 = vmatmul.msk.f32.vlgmr.msrb.gmra.mxu0 %vm130_vm3, %v3160_v61  ;;  %2241 = vmatmul.msk.f32.vlgmr.msrb.gmra.mxu1 %vm130_vm3, %v3160_v61 }
 0xed9   :  { %v1123_v63 = vsel %vm1122_vm9, %v2425_v48, %v1119_v62  ;;  %2247 = vmatmul.msk.f32.vlgmr.msrb.gmra.mxu2 %vm130_vm3, %v3160_v61  ;;  %2262 = vmatmul.msk.f32.vlgmr.msrb.gmra.mxu3 %vm130_vm3, %v3160_v61  ;;  %v2251_v62 = vld [vmem:[%s3517_s9 + $0x20] sm:$0xff] }
 0xeda   :  { %v1125_v24 = vmul.f32 %v1123_v63, %v3086_v11  ;;  %v2265_v11 = vld [vmem:[%s3516_s8 + $0xa8] sm:$0xff] }
 0xedc   :  { %v1130_v1 = vmul.f32 %v2370_v53, %v1125_v24 }
 0xede   :  { %v3171_v2 = vadd.f32 %v2371_v57, %v1130_v1 }
 0xee0   :  { %2236 = vmatmul.msk.f32.gmra.mxu0 %vm130_vm3, %v3171_v2  ;;  %2242 = vmatmul.msk.f32.gmra.mxu1 %vm130_vm3, %v3171_v2 }
 0xee1   :  { %2248 = vmatmul.msk.f32.gmra.mxu2 %vm130_vm3, %v3171_v2  ;;  %2263 = vmatmul.msk.f32.gmra.mxu3 %vm130_vm3, %v3171_v2 }
 0xee9   :  { %2256 = vmatmul.msk.f32.vlgmr.msra.gmra.mxu2 %vm130_vm3, %v3160_v61 }
 0xef1   :  { %2257 = vmatmul.msk.f32.gmra.mxu2 %vm130_vm3, %v3171_v2 }
 0xf55   :  { %v1193_v3 = vpop.f32.mrf.mxu1  ;;  %v1164_v4 = vpop.f32.mrf.mxu0 }
 0xf5c   :  { %v1222_v6 = vpop.f32.mrf.mxu2  ;;  %v1346_v7 = vpop.f32.mrf.mxu3 }
 0xf5d   :  { %v1196_v8 = vpop.f32.mrf.mxu1  ;;  %v1167_v56 = vpop.f32.mrf.mxu0 }
 0xf5e   :  { %v1199_v51 = vpack.c.bf16 %v1196_v8, %v1193_v3  ;;  %v1170_v15 = vpack.c.bf16 %v1167_v56, %v1164_v4 }
 0xf60   :  { %v1233_v10 = vsel %vm282_vm11, %v1199_v51, 0 }
 0xf61   :  { %1242 = vmatpush.bf16.xpose.msra.mxu0 %v1233_v10 }
 0xf64   :  { %v1225_v28 = vpop.f32.mrf.mxu2  ;;  %v1349_v12 = vpop.f32.mrf.mxu3 }
 0xf65   :  { %v1228_v13 = vpack.c.bf16 %v1225_v28, %v1222_v6  ;;  %v1352_v14 = vpack.c.bf16 %v1349_v12, %v1346_v7 }
 0xf67   :  { %v1386_v17 = vsel %vm282_vm11, %v1352_v14, 0  ;;  %1286 = vmatpush.bf16.msra.mxu1 %v1228_v13 }
 0xf68   :  { %2249 = vmatmul.msk.bf16.vlgmr.msra.gmra.mxu0 %vm282_vm11, %v1170_v15 }
 0xf69   :  { %1370 = vmatpush.msrb.mxu0 %v2267_v9 }
 0xf6b   :  { %1371 = vmatpush.msrb.mxu0 %v2266_v22  ;;  %1395 = vmatpush.bf16.xpose.msrb.mxu1 %v1386_v17  ;;  %v2286_v17 = vld [vmem:[%s3515_s7 + $0xd8] sm:$0xff] }
 0xf6c   :  { %v1317_v57 = vpop.f32.mrf.mxu2 }
 0xf6d   :  { %1372 = vmatpush.msrb.mxu0 %v2265_v11 }
 0xf6f   :  { %1373 = vmatpush.msrb.mxu0 %v2264_v16 }
 0xf71   :  { %1498 = vmatpush.msra.mxu0 %v2251_v62 }
 0xf74   :  { %v1320_v20 = vpop.f32.mrf.mxu2 }
 0xf75   :  { %v1323_v60 = vpack.c.bf16 %v1320_v20, %v1317_v57 }
 0xf78   :  { %2268 = vmatmul.msk.f32.vlgmr.msrb.gmra.mxu0 %vm130_vm3, %v3160_v61 }
 0xf80   :  { %2269 = vmatmul.msk.f32.gmra.mxu0 %vm130_vm3, %v3171_v2 }
 0xfe5   :  { %v1244_v21 = vpop.f32.mrf.mxu0 }
 0xfe6   :  { %v1249_v23 = vmul.f32 0.35355338, %v1244_v21  ;;  %v2285_v21 = vld [vmem:[%s3515_s7 + $0xd0] sm:$0xff] }
 0xfe8   :  { %v1251_v27 = vadd.f32 %v3207_v26, %v1249_v23  ;;  %v2284_v23 = vld [vmem:[%s3515_s7 + $0xc8] sm:$0xff] }
 0xfea   :  { %v1253_v18 = vsel %vm307_vm12, %v1251_v27, -inf }
 0xfeb   :  { %1254 = vmax.xlane.f32.xlu2 %v1253_v18 }
 0xfed   :  { %v1246_v19 = vpop.f32.mrf.mxu0 }
 0xfee   :  { %v1250_v29 = vmul.f32 0.35355338, %v1246_v19 }
 0xff0   :  { %v1252_v25 = vadd.f32 %v3214_v30, %v1250_v29 }
 0xff2   :  { %v1256_v31 = vsel %vm307_vm12, %v1252_v25, -inf }
 0xff3   :  { %1257 = vmax.xlane.f32.xlu0 %v1256_v31 }
 0xff5   :  { %v1375_v33 = vpop.f32.mrf.mxu0 }
 0xffd   :  { %v1378_v45 = vpop.f32.mrf.mxu0 }
 0xffe   :  { %v1381_v34 = vpack.c.bf16 %v1378_v45, %v1375_v33 }
0x1000   :  { %1439 = vmatpush.bf16.msrb.mxu2 %v1381_v34  ;;  %v2272_v34 = vld [vmem:[%s3517_s9 + $0x28] sm:$0xff] }
0x1001   :  { %1469 = vmatpush.msra.mxu3 %v2272_v34 }
0x1004   :  { %1552 = vmatpush.msra.mxu2 %v2286_v17 }
0x1006   :  { %1553 = vmatpush.msra.mxu2 %v2285_v21 }
0x1008   :  { %1554 = vmatpush.msra.mxu2 %v2284_v23 }
0x105e   :  { %v1255_v35 = vpop.xlane.xlu2 %1254 }
0x105f   :  { %v1259_v50 = vsub.f32 %v1251_v27, %v1255_v35  ;;  %v2283_v27 = vld [vmem:[%s3515_s7 + $0xc0] sm:$0xff]  ;;  %v2292_v35 = vld [vmem:[%s3516_s8 + $0xd8] sm:$0xff] }
0x1060   :  { %1555 = vmatpush.msra.mxu2 %v2283_v27  ;;  %1581 = vmatpush.msrb.mxu3 %v2292_v35 }
0x1061   :  { %v1261_v36 = vmul.f32 1.442695, %v1259_v50  ;;  %v2291_v50 = vld [vmem:[%s3516_s8 + $0xd0] sm:$0xff] }
0x1062   :  { %1582 = vmatpush.msrb.mxu3 %v2291_v50 }
0x1063   :  { %2426 = vpow2.f32 %v1261_v36  ;;  %v2290_v36 = vld [vmem:[%s3516_s8 + $0xc8] sm:$0xff] }
0x1064   :  { %1583 = vmatpush.msrb.mxu3 %v2290_v36 }
0x1066   :  { %v1258_v37 = vpop.xlane.xlu0 %1257 }
0x1067   :  { %v1260_v38 = vsub.f32 %v1252_v25, %v1258_v37  ;;  %v2289_v37 = vld [vmem:[%s3516_s8 + $0xc0] sm:$0xff] }
0x1068   :  { %1584 = vmatpush.msrb.mxu3 %v2289_v37 }
0x1069   :  { %v2427_v39 = vpop.eup %2426  ;;  %v1263_v40 = vmul.f32 1.442695, %v1260_v38  ;;  %v2303_v38 = vld [vmem:[%s3514_s6 + $0xf8] sm:$0xff] }
0x106a   :  { %v1265_v41 = vsel %vm307_vm12, %v2427_v39, 0.0 }
0x106b   :  { %2428 = vpow2.f32 %v1263_v40  ;;  %1266 = vadd.xlane.f32.xlu1 %v1265_v41  ;;  %v2302_v40 = vld [vmem:[%s3514_s6 + $0xf0] sm:$0xff]  ;;  %v2301_v41 = vld [vmem:[%s3514_s6 + $0xe8] sm:$0xff] }
0x1071   :  { %v2429_v42 = vpop.eup %2428 }
0x1072   :  { %v1268_v43 = vsel %vm307_vm12, %v2429_v42, 0.0 }
0x1073   :  { %1269 = vadd.xlane.f32.xlu2 %v1268_v43 }
0x10de   :  { %v1267_v44 = vpop.xlane.xlu1 %1266 }
0x10df   :  { %2430 = vrcp.f32 %v1267_v44 }
0x10e5   :  { %v2431_v47 = vpop.eup %2430 }
0x10e6   :  { %v1270_v46 = vpop.xlane.xlu2 %1269  ;;  %v1273_v49 = vmul.f32 %v2431_v47, %v2427_v39 }
0x10e7   :  { %2432 = vrcp.f32 %v1270_v46 }
0x10ed   :  { %v2433_v48 = vpop.eup %2432 }
0x10ee   :  { %v1274_v52 = vmul.f32 %v2433_v48, %v2429_v42  ;;  %v2300_v42 = vld [vmem:[%s3514_s6 + $0xe0] sm:$0xff] }
0x10f0   :  { %v1275_v53 = vpack.c.bf16 %v1274_v52, %v1273_v49  ;;  %v2309_v49 = vld [vmem:[%s3515_s7 + $0xf8] sm:$0xff] }
0x10f2   :  { %2250 = vmatmul.msk.bf16.vlgmr.msra.gmra.mxu1 %vm307_vm12, %v1275_v53  ;;  %v2308_v53 = vld [vmem:[%s3515_s7 + $0xf0] sm:$0xff] }
0x10f3   :  { %1523 = vmatpush.msra.mxu1 %v2280_v54 }
0x10f5   :  { %1524 = vmatpush.msra.mxu1 %v2279_v55  ;;  %v2307_v55 = vld [vmem:[%s3515_s7 + $0xe8] sm:$0xff] }
0x10f7   :  { %1525 = vmatpush.msra.mxu1 %v2278_v58  ;;  %v2306_v58 = vld [vmem:[%s3515_s7 + $0xe0] sm:$0xff] }
0x10f9   :  { %1526 = vmatpush.msra.mxu1 %v2277_v59 }
0x1102   :  { %2270 = vmatmul.msk.bf16.vlgmr.msrb.gmra.mxu1 %vm282_vm11, %v1323_v60 }
0x1112   :  { %2281 = vmatmul.msk.f32.vlgmr.msra.gmra.mxu1 %vm130_vm3, %v3160_v61 }
0x111a   :  { %2282 = vmatmul.msk.f32.gmra.mxu1 %vm130_vm3, %v3171_v2 }
0x116f   :  { %v1288_v63 = vpop.f32.mrf.mxu1 }
0x1170   :  { %2275 = vmatmul.msk.f32.vlgmr.msra.gmra.mxu0 %vm282_vm11, %v1288_v63 }
0x1177   :  { %v1290_v24 = vpop.f32.mrf.mxu1 }
0x1178   :  { %2276 = vmatmul.msk.f32.gmra.mxu0 %vm282_vm11, %v1290_v24 }
0x117f   :  { %v1397_v1 = vpop.f32.mrf.mxu1 }
0x1180   :  { %v1402_v3 = vmul.f32 0.35355338, %v1397_v1  ;;  %v2297_v1 = vld [vmem:[%s3517_s9 + $0x30] sm:$0xff] }
0x1182   :  { %v1404_v4 = vadd.f32 %v3207_v26, %v1402_v3 }
0x1184   :  { %v1406_v6 = vsel %vm307_vm12, %v1404_v4, -inf }
0x1185   :  { %1407 = vmax.xlane.f32.xlu0 %v1406_v6 }
0x1187   :  { %v1399_v7 = vpop.f32.mrf.mxu1 }
0x1188   :  { %v1403_v8 = vmul.f32 0.35355338, %v1399_v7 }
0x118a   :  { %v1405_v51 = vadd.f32 %v3214_v30, %v1403_v8 }
0x118c   :  { %v1409_v9 = vsel %vm307_vm12, %v1405_v51, -inf }
0x118d   :  { %1410 = vmax.xlane.f32.xlu1 %v1409_v9 }
0x118f   :  { %v1528_v46 = vpop.f32.mrf.mxu1 }
0x1197   :  { %v1531_v54 = vpop.f32.mrf.mxu1 }
0x1198   :  { %v1534_v57 = vpack.c.bf16 %v1531_v54, %v1528_v46 }
0x11ed   :  { %v3321_v59 = vpop.f32.mrf.mxu0 }
0x11f5   :  { %v1503_v60 = vpop.f32.mrf.mxu0 }
0x11f8   :  { %v1408_v10 = vpop.xlane.xlu0 %1407 }
0x11f9   :  { %v1412_v22 = vsub.f32 %v1404_v4, %v1408_v10 }
0x11fb   :  { %v1414_v56 = vmul.f32 1.442695, %v1412_v22 }
0x11fd   :  { %2434 = vpow2.f32 %v1414_v56 }
0x1200   :  { %v1411_v11 = vpop.xlane.xlu1 %1410 }
0x1201   :  { %v1413_v28 = vsub.f32 %v1405_v51, %v1411_v11 }
0x1203   :  { %v2435_v12 = vpop.eup %2434  ;;  %v1416_v13 = vmul.f32 1.442695, %v1413_v28 }
0x1204   :  { %v1418_v14 = vsel %vm307_vm12, %v2435_v12, 0.0 }
0x1205   :  { %2436 = vpow2.f32 %v1416_v13  ;;  %1419 = vadd.xlane.f32.xlu2 %v1418_v14 }
0x120b   :  { %v2437_v15 = vpop.eup %2436 }
0x120c   :  { %v1421_v16 = vsel %vm307_vm12, %v2437_v15, 0.0 }
0x120d   :  { %1422 = vadd.xlane.f32.xlu0 %v1421_v16 }
0x1278   :  { %v1420_v18 = vpop.xlane.xlu2 %1419 }
0x1279   :  { %2438 = vrcp.f32 %v1420_v18 }
0x127f   :  { %v2439_v29 = vpop.eup %2438 }
0x1280   :  { %v1423_v19 = vpop.xlane.xlu0 %1422  ;;  %v1426_v31 = vmul.f32 %v2439_v29, %v2435_v12 }
0x1281   :  { %2440 = vrcp.f32 %v1423_v19 }
0x1287   :  { %v2441_v25 = vpop.eup %2440 }
0x1288   :  { %v1427_v33 = vmul.f32 %v2441_v25, %v2437_v15  ;;  %v2315_v25 = vld [vmem:[%s3516_s8 + $0xf8] sm:$0xff] }
0x128a   :  { %v1428_v45 = vpack.c.bf16 %v1427_v33, %v1426_v31  ;;  %v2314_v31 = vld [vmem:[%s3516_s8 + $0xf0] sm:$0xff]  ;;  %v2313_v33 = vld [vmem:[%s3516_s8 + $0xe8] sm:$0xff] }
0x128c   :  { %2271 = vmatmul.msk.bf16.vlgmr.msrb.gmra.mxu2 %vm307_vm12, %v1428_v45  ;;  %v2312_v45 = vld [vmem:[%s3516_s8 + $0xe0] sm:$0xff] }
0x128d   :  { %1680 = vmatpush.msrb.mxu2 %v2297_v1 }
0x129c   :  { %2287 = vmatmul.msk.f32.vlgmr.msra.gmra.mxu2 %vm130_vm3, %v3160_v61 }
0x12a4   :  { %2288 = vmatmul.msk.f32.gmra.mxu2 %vm130_vm3, %v3171_v2 }
0x130f   :  { %v1441_v39 = vpop.f32.mrf.mxu2 }
0x1310   :  { %2273 = vmatmul.msk.f32.vlgmr.msra.gmra.mxu3 %vm282_vm11, %v1441_v39 }
0x1311   :  { %1707 = vmatpush.msra.mxu3 %v2303_v38 }
0x1313   :  { %1708 = vmatpush.msra.mxu3 %v2302_v40 }
0x1315   :  { %1709 = vmatpush.msra.mxu3 %v2301_v41 }
0x1317   :  { %v1443_v43 = vpop.f32.mrf.mxu2  ;;  %1710 = vmatpush.msra.mxu3 %v2300_v42 }
0x1318   :  { %2274 = vmatmul.msk.f32.gmra.mxu3 %vm282_vm11, %v1443_v43 }
0x131f   :  { %v1557_v44 = vpop.f32.mrf.mxu2 }
0x1320   :  { %2293 = vmatmul.msk.f32.vlgmr.msrb.gmra.mxu3 %vm130_vm3, %v3160_v61 }
0x1327   :  { %v1560_v47 = vpop.f32.mrf.mxu2 }
0x1328   :  { %v1563_v48 = vpack.c.bf16 %v1560_v47, %v1557_v44  ;;  %2294 = vmatmul.msk.f32.gmra.mxu3 %vm130_vm3, %v3171_v2 }
0x132a   :  { %v1597_v52 = vsel %vm282_vm11, %v1563_v48, 0 }
0x132b   :  { %1606 = vmatpush.bf16.xpose.msrb.mxu0 %v1597_v52 }
0x1330   :  { %2304 = vmatmul.msk.f32.vlgmr.msra.gmra.mxu3 %vm130_vm3, %v3160_v61 }
0x1332   :  { %2295 = vmatmul.msk.bf16.vlgmr.msrb.gmra.mxu0 %vm282_vm11, %v1534_v57 }
0x1333   :  { %1736 = vmatpush.msra.mxu0 %v2309_v49 }
0x1335   :  { %1737 = vmatpush.msra.mxu0 %v2308_v53 }
0x1337   :  { %1738 = vmatpush.msra.mxu0 %v2307_v55 }
0x1338   :  { %2305 = vmatmul.msk.f32.gmra.mxu3 %vm130_vm3, %v3171_v2 }
0x1339   :  { %1739 = vmatpush.msra.mxu0 %v2306_v58 }
0x1342   :  { %2310 = vmatmul.msk.f32.vlgmr.msra.gmra.mxu0 %vm130_vm3, %v3160_v61 }
0x134a   :  { %2311 = vmatmul.msk.f32.gmra.mxu0 %vm130_vm3, %v3171_v2 }
0x1393   :  { %v3323_v20 = vpop.f32.mrf.mxu3 }
0x139b   :  { %v1474_v62 = vpop.f32.mrf.mxu3 }
0x139c   :  { %v3325_v63 = vadd.f32 %v1503_v60, %v1474_v62 }
0x13a3   :  { %v1586_v24 = vpop.f32.mrf.mxu3 }
0x13ab   :  { %v1589_v3 = vpop.f32.mrf.mxu3 }
0x13ac   :  { %v1592_v4 = vpack.c.bf16 %v1589_v3, %v1586_v24 }
0x13ae   :  { %1650 = vmatpush.bf16.msrb.mxu1 %v1592_v4 }
0x13af   :  { %v1608_v6 = vpop.f32.mrf.mxu0 }
0x13b0   :  { %v1613_v7 = vmul.f32 0.35355338, %v1608_v6 }
0x13b2   :  { %v1615_v8 = vadd.f32 %v3207_v26, %v1613_v7  ;;  %1765 = vmatpush.msra.mxu1 %v2315_v25 }
0x13b3   :  { %v1712_v41 = vpop.f32.mrf.mxu3 }
0x13b4   :  { %v1617_v51 = vsel %vm307_vm12, %v1615_v8, -inf  ;;  %1766 = vmatpush.msra.mxu1 %v2314_v31 }
0x13b5   :  { %1618 = vmax.xlane.f32.xlu1 %v1617_v51 }
0x13b6   :  { %1767 = vmatpush.msra.mxu1 %v2313_v33 }
0x13b7   :  { %v1610_v9 = vpop.f32.mrf.mxu0 }
0x13b8   :  { %v1614_v10 = vmul.f32 0.35355338, %v1610_v9  ;;  %1768 = vmatpush.msra.mxu1 %v2312_v45 }
0x13ba   :  { %v1616_v22 = vadd.f32 %v3214_v30, %v1614_v10 }
0x13bb   :  { %v1715_v43 = vpop.f32.mrf.mxu3 }
0x13bc   :  { %v1620_v56 = vsel %vm307_vm12, %v1616_v22, -inf  ;;  %v1718_v44 = vpack.c.bf16 %v1715_v43, %v1712_v41  ;;  %v2327_v41 = vld [vmem:[%s3521_s13 + $0x28] sm:$0xff] }
0x13bd   :  { %1621 = vmax.xlane.f32.xlu2 %v1620_v56 }
0x13bf   :  { %v1741_v11 = vpop.f32.mrf.mxu0 }
0x13c7   :  { %v1744_v28 = vpop.f32.mrf.mxu0 }
0x13c8   :  { %v1747_v12 = vpack.c.bf16 %v1744_v28, %v1741_v11 }
0x13ca   :  { %v1781_v13 = vsel %vm282_vm11, %v1747_v12, 0 }
0x13cb   :  { %1790 = vmatpush.bf16.xpose.msra.mxu2 %v1781_v13 }
0x1428   :  { %v1619_v14 = vpop.xlane.xlu1 %1618 }
0x1429   :  { %v1623_v15 = vsub.f32 %v1615_v8, %v1619_v14 }
0x142b   :  { %v1625_v16 = vmul.f32 1.442695, %v1623_v15 }
0x142d   :  { %2442 = vpow2.f32 %v1625_v16 }
0x1430   :  { %v1622_v17 = vpop.xlane.xlu2 %1621 }
0x1431   :  { %v1624_v21 = vsub.f32 %v1616_v22, %v1622_v17  ;;  %v2372_v17 = vld [vmem:[%s3518_s10 + $0x1] ss:$0 sm:$0xff] }
0x1433   :  { %v2443_v23 = vpop.eup %2442  ;;  %v1627_v27 = vmul.f32 1.442695, %v1624_v21 }
0x1434   :  { %v1629_v18 = vsel %vm307_vm12, %v2443_v23, 0.0 }
0x1435   :  { %2444 = vpow2.f32 %v1627_v27  ;;  %1630 = vadd.xlane.f32.xlu0 %v1629_v18 }
0x143b   :  { %v2445_v19 = vpop.eup %2444 }
0x143c   :  { %v1632_v29 = vsel %vm307_vm12, %v2445_v19, 0.0 }
0x143d   :  { %1633 = vadd.xlane.f32.xlu1 %v1632_v29 }
0x14a8   :  { %v1631_v34 = vpop.xlane.xlu0 %1630 }
0x14a9   :  { %2446 = vrcp.f32 %v1631_v34 }
0x14af   :  { %v2447_v50 = vpop.eup %2446 }
0x14b0   :  { %v1634_v35 = vpop.xlane.xlu1 %1633  ;;  %v1637_v37 = vmul.f32 %v2447_v50, %v2443_v23 }
0x14b1   :  { %2448 = vrcp.f32 %v1634_v35 }
0x14b7   :  { %v2449_v36 = vpop.eup %2448 }
0x14b8   :  { %v1638_v38 = vmul.f32 %v2449_v36, %v2445_v19 }
0x14ba   :  { %v1639_v39 = vpack.c.bf16 %v1638_v38, %v1637_v37 }
0x14bc   :  { %2296 = vmatmul.msk.bf16.vlgmr.msrb.gmra.mxu1 %vm307_vm12, %v1639_v39  ;;  %v2329_v39 = vld [vmem:[%s3521_s13 + $0x38] sm:$0xff] }
0x14bd   :  { %1969 = vmatpush.msrb.mxu1 %v2329_v39 }
0x14cc   :  { %2316 = vmatmul.msk.f32.vlgmr.msra.gmra.mxu1 %vm130_vm3, %v3160_v61  ;;  %v1501_v61 = vadd.f32 %v3321_v59, %v3323_v20 }
0x14d4   :  { %2317 = vmatmul.msk.f32.gmra.mxu1 %vm130_vm3, %v3171_v2 }
0x1539   :  { %v1652_v40 = vpop.f32.mrf.mxu1 }
0x153a   :  { %2298 = vmatmul.msk.f32.vlgmr.msrb.gmra.mxu2 %vm282_vm11, %v1652_v40  ;;  %v2328_v40 = vld [vmem:[%s3521_s13 + $0x30] sm:$0xff] }
0x153b   :  { %1970 = vmatpush.msrb.mxu1 %v2328_v40 }
0x153d   :  { %1971 = vmatpush.msrb.mxu1 %v2327_v41 }
0x1541   :  { %v1654_v42 = vpop.f32.mrf.mxu1 }
0x1542   :  { %2299 = vmatmul.msk.f32.gmra.mxu2 %vm282_vm11, %v1654_v42  ;;  %v2326_v42 = vld [vmem:[%s3521_s13 + $0x20] sm:$0xff] }
0x1543   :  { %1972 = vmatpush.msrb.mxu1 %v2326_v42 }
0x1549   :  { %v1770_v46 = vpop.f32.mrf.mxu1 }
0x154a   :  { %2318 = vmatmul.msk.bf16.vlgmr.msra.gmra.mxu2 %vm282_vm11, %v1718_v44 }
0x1551   :  { %v1773_v47 = vpop.f32.mrf.mxu1 }
0x1552   :  { %v1776_v48 = vpack.c.bf16 %v1773_v47, %v1770_v46  ;;  %v2348_v47 = vld [vmem:[%s3523_s15 + $0xf8] sm:$0xff] }
0x1553   :  { %2004 = vmatpush.msrb.mxu2 %v2348_v47 }
0x1554   :  { %1834 = vmatpush.bf16.msrb.mxu3 %v1776_v48  ;;  %v2347_v48 = vld [vmem:[%s3523_s15 + $0xf0] sm:$0xff] }
0x1555   :  { %2005 = vmatpush.msrb.mxu2 %v2347_v48 }
0x15bd   :  { %v1682_v49 = vpop.f32.mrf.mxu2 }
0x15be   :  { %v1688_v2 = vadd.f32 %v1682_v49, %v1501_v61  ;;  %v2346_v61 = vld [vmem:[%s3523_s15 + $0xe8] sm:$0xff] }
0x15bf   :  { %2006 = vmatpush.msrb.mxu2 %v2346_v61 }
0x15c5   :  { %v1685_v52 = vpop.f32.mrf.mxu2 }
0x15c6   :  { %v1689_v53 = vadd.f32 %v1685_v52, %v3325_v63  ;;  %v2345_v52 = vld [vmem:[%s3523_s15 + $0xe0] sm:$0xff] }
0x15c7   :  { %2007 = vmatpush.msrb.mxu2 %v2345_v52 }
0x15cd   :  { %v1792_v54 = vpop.f32.mrf.mxu2 }
0x15ce   :  { %v1797_v55 = vmul.f32 0.35355338, %v1792_v54 }
0x15d0   :  { %v1799_v57 = vadd.f32 %v3207_v26, %v1797_v55  ;;  %v2344_v55 = vld [vmem:[%s3523_s15 + $0xd8] sm:$0xff] }
0x15d1   :  { %2008 = vmatpush.msrb.mxu2 %v2344_v55  ;;  %v2088_v55 = vld [vmem:[%s3527_s19 + $0x8] sm:$0xff] }
0x15d2   :  { %v1801_v58 = vsel %vm307_vm12, %v1799_v57, -inf }
0x15d3   :  { %1802 = vmax.xlane.f32.xlu2 %v1801_v58  ;;  %v2343_v58 = vld [vmem:[%s3523_s15 + $0xd0] sm:$0xff] }
0x15d4   :  { %2009 = vmatpush.msrb.mxu2 %v2343_v58 }
0x15d5   :  { %v1794_v60 = vpop.f32.mrf.mxu2 }
0x15d6   :  { %v1798_v62 = vmul.f32 0.35355338, %v1794_v60 }
0x15d8   :  { %v1800_v24 = vadd.f32 %v3214_v30, %v1798_v62  ;;  %v2320_v30 = vld [vmem:[%s3517_s9 + $0x38] sm:$0xff]  ;;  %v2342_v62 = vld [vmem:[%s3523_s15 + $0xc8] sm:$0xff] }
0x15d9   :  { %1864 = vmatpush.msrb.mxu0 %v2320_v30  ;;  %2010 = vmatpush.msrb.mxu2 %v2342_v62 }
0x15da   :  { %v1804_v1 = vsel %vm307_vm12, %v1800_v24, -inf }
0x15db   :  { %1805 = vmax.xlane.f32.xlu0 %v1804_v1  ;;  %v2341_v1 = vld [vmem:[%s3523_s15 + $0xc0] sm:$0xff] }
0x15dc   :  { %2011 = vmatpush.msrb.mxu2 %v2341_v1 }
0x1646   :  { %v1803_v59 = vpop.xlane.xlu2 %1802 }
0x1647   :  { %v1807_v20 = vsub.f32 %v1799_v57, %v1803_v59 }
0x1649   :  { %v1809_v3 = vmul.f32 1.442695, %v1807_v20 }
0x164b   :  { %2450 = vpow2.f32 %v1809_v3  ;;  %v2340_v3 = vld [vmem:[%s3523_s15 + $0xb8] sm:$0xff] }
0x164c   :  { %2012 = vmatpush.msrb.mxu2 %v2340_v3 }
0x164e   :  { %v1806_v4 = vpop.xlane.xlu0 %1805 }
0x164f   :  { %v1808_v63 = vsub.f32 %v1800_v24, %v1806_v4 }
0x1651   :  { %v2451_v6 = vpop.eup %2450  ;;  %v1811_v7 = vmul.f32 1.442695, %v1808_v63 }
0x1652   :  { %v1813_v26 = vsel %vm307_vm12, %v2451_v6, 0.0 }
0x1653   :  { %2452 = vpow2.f32 %v1811_v7  ;;  %1814 = vadd.xlane.f32.xlu1 %v1813_v26  ;;  %v2339_v7 = vld [vmem:[%s3523_s15 + $0xb0] sm:$0xff] }
0x1654   :  { %2013 = vmatpush.msrb.mxu2 %v2339_v7 }
0x1659   :  { %v2453_v8 = vpop.eup %2452 }
0x165a   :  { %v1816_v51 = vsel %vm307_vm12, %v2453_v8, 0.0 }
0x165b   :  { %1817 = vadd.xlane.f32.xlu2 %v1816_v51  ;;  %v2374_v51 = vld [vmem:[%s3520_s12 + $0x1] ss:$0 sm:$0xff]  ;;  %s2498_s12 = smov 128  }
0x16c6   :  { %v1815_v9 = vpop.xlane.xlu1 %1814 }
0x16c7   :  { %2454 = vrcp.f32 %v1815_v9  ;;  %v2338_v9 = vld [vmem:[%s3523_s15 + $0xa8] sm:$0xff] }
0x16c8   :  { %2014 = vmatpush.msrb.mxu2 %v2338_v9 }
0x16cd   :  { %v2455_v22 = vpop.eup %2454 }
0x16ce   :  { %v1818_v10 = vpop.xlane.xlu2 %1817  ;;  %v1821_v11 = vmul.f32 %v2455_v22, %v2451_v6  ;;  %v2373_v6 = vld [vmem:[%s3519_s11 + $0x1] ss:$0 sm:$0xff] }
0x16cf   :  { %2456 = vrcp.f32 %v1818_v10 }
0x16d5   :  { %v2457_v56 = vpop.eup %2456 }
0x16d6   :  { %v1822_v28 = vmul.f32 %v2457_v56, %v2453_v8  ;;  %v2337_v56 = vld [vmem:[%s3523_s15 + $0xa0] sm:$0xff] }
0x16d7   :  { %2015 = vmatpush.msrb.mxu2 %v2337_v56 }
0x16d8   :  { %v1823_v12 = vpack.c.bf16 %v1822_v28, %v1821_v11 }
0x16da   :  { %2319 = vmatmul.msk.bf16.vlgmr.msrb.gmra.mxu3 %vm307_vm12, %v1823_v12  ;;  %v2336_v12 = vld [vmem:[%s3523_s15 + $0x98] sm:$0xff] }
0x16db   :  { %2016 = vmatpush.msrb.mxu2 %v2336_v12 }
0x175d   :  { %v1836_v13 = vpop.f32.mrf.mxu3 }
0x175e   :  { %2321 = vmatmul.msk.f32.vlgmr.msrb.gmra.mxu0 %vm282_vm11, %v1836_v13 }
0x1765   :  { %v1838_v14 = vpop.f32.mrf.mxu3 }
0x1766   :  { %2322 = vmatmul.msk.f32.gmra.mxu0 %vm282_vm11, %v1838_v14 }
0x17db   :  { %v1866_v15 = vpop.f32.mrf.mxu0 }
0x17dc   :  { %v1872_v16 = vadd.f32 %v1866_v15, %v1688_v2 }
0x17de   :  { %v1874_v21 = vadd.f32 %v1872_v16, %v3068_v0 }
0x17e0   :  { %v3376_v23 = vadd.f32 %v2372_v17, %v1874_v21  ;;  %v2335_v21 = vld [vmem:[%s3523_s15 + $0x90] sm:$0xff] }
0x17e1   :  { %2017 = vmatpush.msrb.mxu2 %v2335_v21 }
0x17e2   :  { %v1887_v27 = vsel %vm130_vm3, %v3376_v23, 0.0 }
0x17e3   :  { %1888 = vadd.xlane.f32.xlu0 %v1887_v27  ;;  %v1869_v18 = vpop.f32.mrf.mxu0  ;;  %v2334_v27 = vld [vmem:[%s3523_s15 + $0x88] sm:$0xff] }
0x17e4   :  { %v1873_v19 = vadd.f32 %v1869_v18, %v1689_v53  ;;  %2018 = vmatpush.msrb.mxu2 %v2334_v27  ;;  %v2333_v18 = vld [vmem:[%s3523_s15 + $0x80] sm:$0xff] }
0x17e6   :  { %v1875_v29 = vadd.f32 %v1873_v19, %v3073_v5  ;;  %2019 = vmatpush.msrb.mxu2 %v2333_v18  ;;  %v2375_v19 = vld [vmem:[%s3522_s14 + $0x1] ss:$0 sm:$0xff] }
0x17e8   :  { %v3381_v25 = vadd.f32 %v2372_v17, %v1875_v29 }
0x17ea   :  { %v1890_v31 = vsel %vm130_vm3, %v3381_v25, 0.0 }
0x17eb   :  { %1891 = vadd.xlane.f32.xlu1 %v1890_v31 }
0x1856   :  { %v1889_v33 = vpop.xlane.xlu0 %1888 }
0x1857   :  { %v1893_v45 = vmul.f32 %v1889_v33, %v2654_v32 }
0x1859   :  { %v1895_v0 = vsub.f32 %v3376_v23, %v1893_v45 }
0x185b   :  { %v1897_v34 = vmul.f32 %v1895_v0, %v1895_v0 }
0x185d   :  { %v1899_v35 = vsel %vm130_vm3, %v1897_v34, 0.0 }
0x185e   :  { %1900 = vadd.xlane.f32.xlu2 %v1899_v35  ;;  %v1892_v50 = vpop.xlane.xlu1 %1891  ;;  %v2376_v35 = vld [vmem:[%s3550_s30 + $0x1] ss:$0 sm:$0xff] }
0x185f   :  { %v1894_v36 = vmul.f32 %v1892_v50, %v2654_v32 }
0x1861   :  { %v3390_v5 = vsub.f32 %v3381_v25, %v1894_v36 }
0x1863   :  { %v1898_v37 = vmul.f32 %v3390_v5, %v3390_v5 }
0x1865   :  { %v1902_v38 = vsel %vm130_vm3, %v1898_v37, 0.0 }
0x1866   :  { %1903 = vadd.xlane.f32.xlu0 %v1902_v38 }
0x18d1   :  { %v1901_v43 = vpop.xlane.xlu2 %1900 }
0x18d2   :  { %v1905_v44 = vmul.f32 %v1901_v43, %v2654_v32 }
0x18d4   :  { %v1907_v46 = vadd.f32 1e-05, %v1905_v44 }
0x18d6   :  { %2458 = vrsqrt.f32 %v1907_v46  ;;  %vm1915_vm11 = vweird.f32 %v1907_v46 }
0x18d9   :  { %v1904_v49 = vpop.xlane.xlu0 %1903 }
0x18da   :  { %v1906_v2 = vmul.f32 %v1904_v49, %v2654_v32 }
0x18dc   :  { %v2459_v53 = vpop.eup %2458  ;;  %v1908_v54 = vadd.f32 1e-05, %v1906_v2 }
0x18dd   :  { %v1910_v57 = vmul.f32 %v2459_v53, %v1907_v46  ;;  %vm1916_vm10 = vweird.f32 %v2459_v53 }
0x18de   :  { %2460 = vrsqrt.f32 %v1908_v54  ;;  %vm1917_vm12 = vmor %vm1915_vm11, %vm1916_vm10  ;;  %vm1925_vm14 = vweird.f32 %v1908_v54 }
0x18df   :  { %v1911_v60 = vmul.f32 %v2459_v53, %v1910_v57  ;;  %v2087_v57 = vld [vmem:[%s3527_s19] sm:$0xff] }
0x18e1   :  { %v1912_v24 = vmul.f32 0.5, %v1911_v60 }
0x18e3   :  { %v1913_v59 = vsub.f32 1.5, %v1912_v24 }
0x18e4   :  { %v2461_v20 = vpop.eup %2460 }
0x18e5   :  { %v1914_v4 = vmul.f32 %v2459_v53, %v1913_v59  ;;  %v1920_v63 = vmul.f32 %v2461_v20, %v1908_v54  ;;  %vm1926_vm13 = vweird.f32 %v2461_v20  ;;  %v2089_v54 = vld [vmem:[%s3527_s19 + $0x10] sm:$0xff] }
0x18e6   :  { %vm1927_vm15 = vmor %vm1925_vm14, %vm1926_vm13 }
0x18e7   :  { %v1918_v26 = vsel %vm1917_vm12, %v2459_v53, %v1914_v4  ;;  %v1921_v8 = vmul.f32 %v2461_v20, %v1920_v63 }
0x18e8   :  { %v1929_v30 = vmul.f32 %v1918_v26, %v1895_v0 }
0x18e9   :  { %v1922_v10 = vmul.f32 0.5, %v1921_v8 }
0x18ea   :  { %v1934_v22 = vmul.f32 %v2373_v6, %v1929_v30 }
0x18eb   :  { %v1923_v11 = vsub.f32 1.5, %v1922_v10 }
0x18ec   :  { %v1939_v28 = vadd.f32 %v2374_v51, %v1934_v22 }
0x18ed   :  { %v1924_v13 = vmul.f32 %v2461_v20, %v1923_v11 }
0x18ee   :  { %2331 = vmatmul.msk.f32.vlgmr.msrb.gmra.mxu1 %vm130_vm3, %v1939_v28 }
0x18ef   :  { %v1928_v14 = vsel %vm1927_vm15, %v2461_v20, %v1924_v13 }
0x18f0   :  { %v1930_v15 = vmul.f32 %v1928_v14, %v3390_v5 }
0x18f2   :  { %v1935_v16 = vmul.f32 %v2373_v6, %v1930_v15 }
0x18f4   :  { %v1940_v17 = vadd.f32 %v2374_v51, %v1935_v16  ;;  %v2377_v51 = vld [vmem:[%s3525_s17] ss:$0 sm:$0xff] }
0x18f6   :  { %2332 = vmatmul.msk.f32.gmra.mxu1 %vm130_vm3, %v1940_v17  ;;  %v2379_v17 = vld [vmem:[%s3528_s20] ss:$0 sm:$0xff] }
0x196b   :  { %v1974_v29 = vpop.f32.mrf.mxu1 }
0x196c   :  { %v1975_v31 = vadd.f32 %v2375_v19, %v1974_v29 }
0x196e   :  { %v1980_v33 = vmax.f32 %v1975_v31, 0.0 }
0x1970   :  { %2020 = vmatmul.f32.vlgmr.msrb.gmra.mxu2 %v1980_v33 }
0x1973   :  { %v1977_v45 = vpop.f32.mrf.mxu1 }
0x1974   :  { %v1978_v0 = vadd.f32 %v2375_v19, %v1977_v45 }
0x1976   :  { %v1981_v34 = vmax.f32 %v1978_v0, 0.0 }
0x1978   :  { %2023 = vmatmul.f32.gmra.mxu2 %v1981_v34 }
0x19f3   :  { %v2021_v50 = vpop.f32.mrf.mxu2 }
0x19f4   :  { %v2022_v36 = vadd.f32 %v2376_v35, %v2021_v50 }
0x19f6   :  { %v2027_v5 = vmax.f32 %v2022_v36, 0.0 }
0x19f8   :  { %v2029_v37 = vadd.f32 %v2027_v5, %v3376_v23 }
0x19fa   :  { %v2033_v38 = vsel %vm130_vm3, %v2029_v37, 0.0 }
0x19fb   :  { %2034 = vadd.xlane.f32.xlu1 %v2033_v38  ;;  %v2024_v39 = vpop.f32.mrf.mxu2 }
0x19fc   :  { %v2025_v40 = vadd.f32 %v2376_v35, %v2024_v39 }
0x19fe   :  { %v2028_v41 = vmax.f32 %v2025_v40, 0.0 }
0x1a00   :  { %v2030_v42 = vadd.f32 %v2028_v41, %v3381_v25  ;;  %v2090_v25 = vld [vmem:[%s3527_s19 + $0x18] sm:$0xff] }
0x1a01   :  { %2113 = vmatpush.msra.mxu3 %v2090_v25 }
0x1a02   :  { %v2036_v43 = vsel %vm130_vm3, %v2030_v42, 0.0 }
0x1a03   :  { %2037 = vadd.xlane.f32.xlu2 %v2036_v43  ;;  %2114 = vmatpush.msra.mxu3 %v2089_v54 }
0x1a05   :  { %2115 = vmatpush.msra.mxu3 %v2088_v55 }
0x1a07   :  { %2116 = vmatpush.msra.mxu3 %v2087_v57 }
0x1a6e   :  { %v2035_v44 = vpop.xlane.xlu1 %2034 }
0x1a6f   :  { %v2039_v46 = vmul.f32 %v2035_v44, %v2654_v32 }
0x1a71   :  { %v2041_v47 = vsub.f32 %v2029_v37, %v2039_v46 }
0x1a73   :  { %v2043_v48 = vmul.f32 %v2041_v47, %v2041_v47 }
0x1a75   :  { %v2045_v61 = vsel %vm130_vm3, %v2043_v48, 0.0 }
0x1a76   :  { %v2038_v49 = vpop.xlane.xlu2 %2037  ;;  %2046 = vadd.xlane.f32.xlu0 %v2045_v61 }
0x1a77   :  { %v2040_v23 = vmul.f32 %v2038_v49, %v2654_v32 }
0x1a79   :  { %v2042_v2 = vsub.f32 %v2030_v42, %v2040_v23 }
0x1a7b   :  { %v2044_v52 = vmul.f32 %v2042_v2, %v2042_v2 }
0x1a7d   :  { %v2048_v53 = vsel %vm130_vm3, %v2044_v52, 0.0 }
0x1a7e   :  { %2049 = vadd.xlane.f32.xlu1 %v2048_v53 }
0x1ae9   :  { %v2047_v58 = vpop.xlane.xlu0 %2046 }
0x1aea   :  { %v2051_v60 = vmul.f32 %v2047_v58, %v2654_v32 }
0x1aec   :  { %v2053_v62 = vadd.f32 1e-05, %v2051_v60 }
0x1aee   :  { %2462 = vrsqrt.f32 %v2053_v62  ;;  %vm2061_vm1 = vweird.f32 %v2053_v62 }
0x1af1   :  { %v2050_v24 = vpop.xlane.xlu1 %2049 }
0x1af2   :  { %v2052_v1 = vmul.f32 %v2050_v24, %v2654_v32  ;;  %v2378_v32 = vld [vmem:[%s3526_s18] ss:$0 sm:$0xff]  ;;  %s2497_s18 = smov [#allocation2]  }
0x1af3   :  { %s2130_s11 = sshll.u32 %s2497_s18, 4  ;;  %s2131_s11 = int_to_ptr.vmem [resolvable:$true] %s2130_s11 }
0x1af4   :  { %v2463_v59 = vpop.eup %2462  ;;  %v2054_v20 = vadd.f32 1e-05, %v2052_v1 }
0x1af5   :  { %v2056_v3 = vmul.f32 %v2463_v59, %v2053_v62  ;;  %vm2062_vm0 = vweird.f32 %v2463_v59 }
0x1af6   :  { %2464 = vrsqrt.f32 %v2054_v20  ;;  %vm2063_vm2 = vmor %vm2061_vm1, %vm2062_vm0  ;;  %vm2071_vm5 = vweird.f32 %v2054_v20 }
0x1af7   :  { %v2057_v4 = vmul.f32 %v2463_v59, %v2056_v3 }
0x1af9   :  { %v2058_v63 = vmul.f32 0.5, %v2057_v4 }
0x1afb   :  { %v2059_v6 = vsub.f32 1.5, %v2058_v63 }
0x1afc   :  { %v2465_v7 = vpop.eup %2464 }
0x1afd   :  { %v2060_v26 = vmul.f32 %v2463_v59, %v2059_v6  ;;  %v2066_v8 = vmul.f32 %v2465_v7, %v2054_v20  ;;  %vm2072_vm4 = vweird.f32 %v2465_v7 }
0x1afe   :  { %vm2073_vm6 = vmor %vm2071_vm5, %vm2072_vm4 }
0x1aff   :  { %v2064_v30 = vsel %vm2063_vm2, %v2463_v59, %v2060_v26  ;;  %v2067_v9 = vmul.f32 %v2465_v7, %v2066_v8 }
0x1b00   :  { %v2075_v10 = vmul.f32 %v2064_v30, %v2041_v47 }
0x1b01   :  { %v2068_v22 = vmul.f32 0.5, %v2067_v9 }
0x1b02   :  { %v2080_v56 = vmul.f32 %v2377_v51, %v2075_v10 }
0x1b03   :  { %v2069_v11 = vsub.f32 1.5, %v2068_v22 }
0x1b04   :  { %v2085_v28 = vadd.f32 %v2378_v32, %v2080_v56 }
0x1b05   :  { %v2070_v12 = vmul.f32 %v2465_v7, %v2069_v11 }
0x1b06   :  { %2350 = vmatmul.msk.f32.vlgmr.msra.gmra.mxu3 %vm130_vm3, %v2085_v28 }
0x1b07   :  { %v2074_v13 = vsel %vm2073_vm6, %v2465_v7, %v2070_v12 }
0x1b08   :  { %v2076_v14 = vmul.f32 %v2074_v13, %v2042_v2 }
0x1b0a   :  { %v2081_v15 = vmul.f32 %v2377_v51, %v2076_v14 }
0x1b0c   :  { %v2086_v16 = vadd.f32 %v2378_v32, %v2081_v15 }
0x1b0e   :  { %2351 = vmatmul.msk.f32.gmra.mxu3 %vm130_vm3, %v2086_v16 }
0x1b89   :  { %v2118_v21 = vpop.f32.mrf.mxu3 }
0x1b8a   :  { %v2119_v27 = vadd.f32 %v2379_v17, %v2118_v21 }
0x1b8c   :  { %2124 = vst [vmem:[#allocation2] sm:$0xff] %v2119_v27 }
0x1b91   :  { %v2121_v18 = vpop.f32.mrf.mxu3 }
0x1b92   :  { %v2122_v19 = vadd.f32 %v2379_v17, %v2121_v18 }
0x1b94   :  { %2125 = vst [vmem:[#allocation2 + $0x8] sm:$0xff] %v2122_v19 }
0x1b95   :  { %2138 = dma.vmem_to_hbm [thread:$0]  %s2131_s11, 256, %s2133_s28, [#allocation3], %s2498_s12, %s2498_s12, %s2499_s26  }
0x1b96   :  { %2492 = dma.done.wait [#allocation3], 256  }
0x1b97   :  { %2493 = vsyncadd [#allocation3], 4294967040 }
0x1b98   :  { %2143 = vsyncpa [#allocation3], 1 }

</bundles_post_ra>
